<compile_context>
chip_gen: v7x
topology: tpu7x:2x2x1
jax: 0.10.0
libtpu: 0.0.40
codegen_flags: <defaults>
</compile_context>

<pallas_src>
import functools

import jax
import jax.numpy as jnp
from jax.experimental import pallas as pl
from jax.experimental.pallas import tpu as pltpu


def _self_attention_kernel(gamma_ref,        # SMEM (1,)
                           x_ref,            # VMEM (N, C)  compute dtype
                           wqk_ref,          # VMEM (C, C)  compute dtype
                           bqk_ref,          # VMEM (1, C)  f32
                           wv_ref,           # VMEM (C, C)  compute dtype
                           bv_ref,           # VMEM (1, C)  f32
                           out_ref,          # VMEM (TQ, C) f32
                           attn_ref,         # VMEM (TQ, N) f32
                           *, tq, approx_recip):
    cdt = x_ref.dtype                                   # MXU operand dtype
    qi = pl.program_id(1)
    q0 = pl.multiple_of(qi * tq, tq)

    x_all = x_ref[...]                                  # (N, C)  keys/values
    x_q = x_ref[pl.ds(q0, tq), :]                       # (TQ, C) query rows

    # Fused Q.K^T:  energy[i, j] = (x_i Wq + bq) . (x_j Wk + bk)
    #   = x_i (Wq Wk^T) x_j^T + (bq Wk^T) . x_j  [+ per-row consts that cancel]
    t = jnp.dot(x_q, wqk_ref[...],
                preferred_element_type=jnp.float32) + bqk_ref[...]     # (TQ, C) f32
    energy = jax.lax.dot_general(
        t.astype(cdt), x_all, (((1,), (1,)), ((), ())),
        preferred_element_type=jnp.float32)                            # (TQ, N) f32

    # Numerically stable softmax over keys (f32 throughout).
    m = jnp.max(energy, axis=-1, keepdims=True)
    e = jnp.exp(energy - m)
    attn = e * pl.reciprocal(jnp.sum(e, axis=-1, keepdims=True),
                             approx=approx_recip)                      # (TQ, N) f32

    # Value projection (recomputed per query tile; cheap vs. the energy matmul
    # and keeps both grid axes 'parallel').
    v = jnp.dot(x_all, wv_ref[...],
                preferred_element_type=jnp.float32) + bv_ref[...]      # (N, C) f32

    o = jnp.dot(attn.astype(cdt), v.astype(cdt),
                preferred_element_type=jnp.float32)                    # (TQ, C) f32

    out_ref[...] = (gamma_ref[0] * o + x_q.astype(jnp.float32)).astype(out_ref.dtype)
    attn_ref[...] = attn.astype(attn_ref.dtype)


def _pick_tq(n, target=128):
    """Largest divisor of n that is a multiple of 8 and <= target (else n)."""
    if n <= target:
        return n
    for cand in range(target, 7, -8):
        if n % cand == 0:
            return cand
    return n  # fall back to a single full-N block (always BlockSpec-legal)


def _assert_vmem_budget(n, c, tq, in_itemsize):
    # Conservative: assume every block is double-buffered by the pipeline.
    bytes_needed = 2 * (
        n * c * in_itemsize          # x slab (keys/values), resident per batch
        + 2 * c * c * in_itemsize    # wqk + wv
        + 2 * c * 4                  # bqk + bv (f32)
        + tq * c * 4                 # out tile (f32)
        + tq * n * 4                 # attention-map tile (f32)
    )
    limit = 24 * 1024 * 1024  # stay under the 32 MiB default scoped VMEM (v7x: 64 MiB total)
    if bytes_needed > limit:
        raise ValueError(
            f"Tile config needs ~{bytes_needed / 2**20:.1f} MiB VMEM "
            f"(> {limit / 2**20:.0f} MiB budget); reduce tq or use bf16 inputs.")


def self_attention_pallas(x_nchw, wq, wk, wv, bq, bk, bv, gamma, *,
                          tq=128, use_bf16=True, approx_recip=True):
    """x_nchw: (B, C, W, H) float32.  Returns (out_nchw, attention_map).

    `bk` only contributes softmax-row-constant energy terms, which cancel
    exactly; it is accepted for interface parity but unused.
    """
    del bk
    B, C, W, H = x_nchw.shape
    N = W * H
    compute_dtype = jnp.bfloat16 if use_bf16 else jnp.float32

    TQ = _pick_tq(N, tq)
    assert N % TQ == 0
    _assert_vmem_budget(N, C, TQ, jnp.dtype(compute_dtype).itemsize)

    # Fused Q/K projection (tiny wrapper-side matmuls over the weights only).
    wqk = jnp.dot(wq, wk.T)                      # (C, C)
    bqk = jnp.dot(bq, wk.T).astype(jnp.float32)  # (1, C) key-side bias row

    # NCHW -> (B, N, C), N flattened over (W, H) row-major (matches torch .view)
    x_flat = jnp.transpose(x_nchw, (0, 2, 3, 1)).reshape(B, N, C)

    kernel = functools.partial(_self_attention_kernel,
                               tq=TQ, approx_recip=approx_recip)

    grid_spec = pltpu.PrefetchScalarGridSpec(
        num_scalar_prefetch=0,
        grid=(B, N // TQ),
        in_specs=[
            pl.BlockSpec(memory_space=pltpu.MemorySpace.SMEM),           # gamma
            pl.BlockSpec((None, N, C), lambda b, qi: (b, 0, 0)),         # x (K/V resident per batch)
            pl.BlockSpec((C, C), lambda b, qi: (0, 0)),                  # wqk
            pl.BlockSpec((1, C), lambda b, qi: (0, 0)),                  # bqk
            pl.BlockSpec((C, C), lambda b, qi: (0, 0)),                  # wv
            pl.BlockSpec((1, C), lambda b, qi: (0, 0)),                  # bv
        ],
        out_specs=[
            pl.BlockSpec((None, TQ, C), lambda b, qi: (b, qi, 0)),       # out  (B, N, C)
            pl.BlockSpec((None, TQ, N), lambda b, qi: (b, qi, 0)),       # attn (B, N, N), lane-dense
        ],
    )

    out_flat, attn = pl.pallas_call(
        kernel,
        out_shape=(
            jax.ShapeDtypeStruct((B, N, C), jnp.float32),
            jax.ShapeDtypeStruct((B, N, N), jnp.float32),
        ),
        grid_spec=grid_spec,
        compiler_params=pltpu.CompilerParams(
            dimension_semantics=("parallel", "parallel")),
    )(gamma.astype(jnp.float32),
      x_flat.astype(compute_dtype),
      wqk.astype(compute_dtype),
      bqk,
      wv.astype(compute_dtype),
      bv.astype(jnp.float32))

    # (B, N, C) -> (B, C, W, H)
    out_nchw = jnp.transpose(out_flat.reshape(B, W, H, C), (0, 3, 1, 2))
    return out_nchw, attn


def _reference(x_nchw, wq, wk, wv, bq, bk, bv, gamma):
    """Pure-JAX f32 reference mirroring the PyTorch forward exactly."""
    B, C, W, H = x_nchw.shape
    N = W * H
    x_flat = x_nchw.reshape(B, C, N)                                  # (B, C, N)
    q = jnp.einsum('bcn,co->bon', x_flat, wq) + bq.reshape(1, -1, 1)  # (B, C/8, N)
    k = jnp.einsum('bcn,co->bon', x_flat, wk) + bk.reshape(1, -1, 1)
    v = jnp.einsum('bcn,co->bon', x_flat, wv) + bv.reshape(1, -1, 1)  # (B, C, N)
    energy = jnp.einsum('bci,bcj->bij', q, k)                         # (B, N, N)
    attn = jax.nn.softmax(energy, axis=-1)
    out = jnp.einsum('bcj,bij->bci', v, attn)                         # (B, C, N)
    out = out.reshape(B, C, W, H)
    return gamma[0] * out + x_nchw, attn


if __name__ == "__main__":
    key = jax.random.PRNGKey(0)
    B, C, W, H = 2, 32, 16, 16        # in_dim = 32  ->  query/key channels = 4
    C8 = C // 8
    N = W * H

    ks = jax.random.split(key, 8)
    x = jax.random.normal(ks[0], (B, C, W, H), dtype=jnp.float32)

    # 1x1 conv weights stored transposed: (in_channels, out_channels).
    wq = jax.random.normal(ks[1], (C, C8), dtype=jnp.float32) * 0.1
    wk = jax.random.normal(ks[2], (C, C8), dtype=jnp.float32) * 0.1
    wv = jax.random.normal(ks[3], (C, C), dtype=jnp.float32) * 0.1
    bq = jax.random.normal(ks[4], (1, C8), dtype=jnp.float32) * 0.05
    bk = jax.random.normal(ks[5], (1, C8), dtype=jnp.float32) * 0.05
    bv = jax.random.normal(ks[6], (1, C), dtype=jnp.float32) * 0.05
    # nn.Parameter(torch.zeros(1)) would make out == x; use a nonzero gamma so
    # the attention path is actually exercised by the numeric check.
    gamma = jnp.full((1,), 0.7, dtype=jnp.float32)

    ref_out, ref_attn = _reference(x, wq, wk, wv, bq, bk, bv, gamma)

    # Exact-math config (f32 MXU operands, exact reciprocal): tight tolerance.
    out32, attn32 = self_attention_pallas(x, wq, wk, wv, bq, bk, bv, gamma,
                                          use_bf16=False, approx_recip=False)
    out32 = jax.block_until_ready(out32)
    attn32 = jax.block_until_ready(attn32)
    assert out32.shape == (B, C, W, H) and attn32.shape == (B, N, N)
    assert jnp.allclose(out32, ref_out, atol=1e-4, rtol=1e-4)
    assert jnp.allclose(attn32, ref_attn, atol=1e-4, rtol=1e-4)

    # Fast config (bf16 MXU operands + EUP approx reciprocal): looser tolerance.
    out16, attn16 = self_attention_pallas(x, wq, wk, wv, bq, bk, bv, gamma,
                                          use_bf16=True, approx_recip=True)
    out16 = jax.block_until_ready(out16)
    attn16 = jax.block_until_ready(attn16)
    assert out16.shape == (B, C, W, H) and attn16.shape == (B, N, N)
    assert jnp.allclose(out16, ref_out, atol=2e-2, rtol=2e-2)
    assert jnp.allclose(attn16, ref_attn, atol=5e-3, rtol=5e-2)

    print("KERNEL_OK")
</pallas_src>

<mosaic_0001>
module attributes {stable_mosaic.version = 11 : i64} {
  func.func @_self_attention_kernel(%arg0: i32, %arg1: i32, %arg2: memref<1xf32, #tpu.memory_space<smem>>, %arg3: memref<1x256x32xf32, #tpu.memory_space<vmem>>, %arg4: memref<32x32xf32, #tpu.memory_space<vmem>>, %arg5: memref<1x32xf32, #tpu.memory_space<vmem>>, %arg6: memref<32x32xf32, #tpu.memory_space<vmem>>, %arg7: memref<1x32xf32, #tpu.memory_space<vmem>>, %arg8: memref<1x128x32xf32, #tpu.memory_space<vmem>>, %arg9: memref<1x128x256xf32, #tpu.memory_space<vmem>>) attributes {dimension_semantics = [#tpu.dimension_semantics<parallel>, #tpu.dimension_semantics<parallel>], iteration_bounds = array<i64: 2, 2>, scalar_prefetch = 0 : i64, scratch_operands = 0 : i64, tpu.core_type = #tpu.core_type<tc>, window_params = [{transform_indices = @transform_0, window_bounds = array<i64: 1>}, {transform_indices = @transform_1, window_bounds = array<i64: 1, 256, 32>}, {pipeline_mode = #tpu.pipeline_mode<synchronous>, transform_indices = @transform_2, window_bounds = array<i64: 32, 32>}, {pipeline_mode = #tpu.pipeline_mode<synchronous>, transform_indices = @transform_3, window_bounds = array<i64: 1, 32>}, {pipeline_mode = #tpu.pipeline_mode<synchronous>, transform_indices = @transform_4, window_bounds = array<i64: 32, 32>}, {pipeline_mode = #tpu.pipeline_mode<synchronous>, transform_indices = @transform_5, window_bounds = array<i64: 1, 32>}, {transform_indices = @transform_6, window_bounds = array<i64: 1, 128, 32>}, {transform_indices = @transform_7, window_bounds = array<i64: 1, 128, 256>}]} {
    %c128_i32 = arith.constant 128 : i32
    %0 = arith.muli %arg1, %c128_i32 : i32
    %1 = tpu.assume_multiple %0, 128 : i32
    %c0 = arith.constant 0 : index
    %c0_0 = arith.constant 0 : index
    %c0_1 = arith.constant 0 : index
    %2 = vector.load %arg3[%c0, %c0_0, %c0_1] : memref<1x256x32xf32, #tpu.memory_space<vmem>>, vector<1x256x32xf32>
    %3 = vector.shape_cast %2 : vector<1x256x32xf32> to vector<256x32xf32>
    %c0_2 = arith.constant 0 : index
    %4 = arith.index_cast %1 : i32 to index
    %c0_3 = arith.constant 0 : index
    %5 = vector.load %arg3[%c0_2, %4, %c0_3] : memref<1x256x32xf32, #tpu.memory_space<vmem>>, vector<1x128x32xf32>
    %6 = vector.shape_cast %5 : vector<1x128x32xf32> to vector<128x32xf32>
    %c0_4 = arith.constant 0 : index
    %c0_5 = arith.constant 0 : index
    %7 = vector.load %arg4[%c0_4, %c0_5] : memref<32x32xf32, #tpu.memory_space<vmem>>, vector<32x32xf32>
    %cst = arith.constant dense<0.000000e+00> : vector<128x32xf32>
    %8 = tpu.matmul %6, %7, %cst {dimension_numbers = #tpu.dot_dimension_numbers<[1], [0], [0], [1], [0, 0, 1, 1], [], []>} : vector<128x32xf32>, vector<32x32xf32>, vector<128x32xf32> -> vector<128x32xf32>
    %c0_6 = arith.constant 0 : index
    %c0_7 = arith.constant 0 : index
    %9 = vector.load %arg5[%c0_6, %c0_7] : memref<1x32xf32, #tpu.memory_space<vmem>>, vector<1x32xf32>
    %10 = vector.broadcast %9 : vector<1x32xf32> to vector<128x32xf32>
    %11 = arith.addf %8, %10 : vector<128x32xf32>
    %cst_8 = arith.constant dense<0.000000e+00> : vector<128x256xf32>
    %12 = tpu.matmul %11, %3, %cst_8 {dimension_numbers = #tpu.dot_dimension_numbers<[1], [1], [0], [0], [0, 0, 1, 0], [], []>} : vector<128x32xf32>, vector<256x32xf32>, vector<128x256xf32> -> vector<128x256xf32>
    %cst_9 = arith.constant dense<0xFF800000> : vector<128xf32>
    %13 = vector.multi_reduction <maximumf>, %12, %cst_9 [1] : vector<128x256xf32> to vector<128xf32>
    %14 = vector.shape_cast %13 : vector<128xf32> to vector<128x1xf32>
    %15 = vector.broadcast %14 : vector<128x1xf32> to vector<128x256xf32>
    %16 = arith.subf %12, %15 : vector<128x256xf32>
    %17 = math.exp %16 : vector<128x256xf32>
    %cst_10 = arith.constant dense<0.000000e+00> : vector<128xf32>
    %18 = vector.multi_reduction <add>, %17, %cst_10 [1] : vector<128x256xf32> to vector<128xf32>
    %19 = vector.shape_cast %18 : vector<128xf32> to vector<128x1xf32>
    %20 = tpu.reciprocal %19 : vector<128x1xf32> -> vector<128x1xf32>
    %21 = vector.broadcast %20 : vector<128x1xf32> to vector<128x256xf32>
    %22 = arith.mulf %17, %21 : vector<128x256xf32>
    %c0_11 = arith.constant 0 : index
    %c0_12 = arith.constant 0 : index
    %23 = vector.load %arg6[%c0_11, %c0_12] : memref<32x32xf32, #tpu.memory_space<vmem>>, vector<32x32xf32>
    %cst_13 = arith.constant dense<0.000000e+00> : vector<256x32xf32>
    %24 = tpu.matmul %3, %23, %cst_13 {dimension_numbers = #tpu.dot_dimension_numbers<[1], [0], [0], [1], [0, 0, 1, 1], [], []>} : vector<256x32xf32>, vector<32x32xf32>, vector<256x32xf32> -> vector<256x32xf32>
    %c0_14 = arith.constant 0 : index
    %c0_15 = arith.constant 0 : index
    %25 = vector.load %arg7[%c0_14, %c0_15] : memref<1x32xf32, #tpu.memory_space<vmem>>, vector<1x32xf32>
    %26 = vector.broadcast %25 : vector<1x32xf32> to vector<256x32xf32>
    %27 = arith.addf %24, %26 : vector<256x32xf32>
    %cst_16 = arith.constant dense<0.000000e+00> : vector<128x32xf32>
    %28 = tpu.matmul %22, %27, %cst_16 {dimension_numbers = #tpu.dot_dimension_numbers<[1], [0], [0], [1], [0, 0, 1, 1], [], []>} : vector<128x256xf32>, vector<256x32xf32>, vector<128x32xf32> -> vector<128x32xf32>
    %c0_17 = arith.constant 0 : index
    %29 = memref.load %arg2[%c0_17] : memref<1xf32, #tpu.memory_space<smem>>
    %30 = vector.broadcast %29 : f32 to vector<128x32xf32>
    %31 = arith.mulf %30, %28 : vector<128x32xf32>
    %32 = arith.addf %31, %6 : vector<128x32xf32>
    %c0_18 = arith.constant 0 : index
    %c0_19 = arith.constant 0 : index
    %c0_20 = arith.constant 0 : index
    %33 = vector.load %arg8[%c0_18, %c0_19, %c0_20] : memref<1x128x32xf32, #tpu.memory_space<vmem>>, vector<1x128x32xf32>
    %34 = vector.shape_cast %33 : vector<1x128x32xf32> to vector<128x32xf32>
    %35 = vector.shape_cast %32 : vector<128x32xf32> to vector<1x128x32xf32>
    tpu.vector_store %arg8[%c0_18, %c0_19, %c0_20], %35 {strides = array<i32>} : memref<1x128x32xf32, #tpu.memory_space<vmem>>, vector<1x128x32xf32>,
    %c0_21 = arith.constant 0 : index
    %c0_22 = arith.constant 0 : index
    %c0_23 = arith.constant 0 : index
    %36 = vector.load %arg9[%c0_21, %c0_22, %c0_23] : memref<1x128x256xf32, #tpu.memory_space<vmem>>, vector<1x128x256xf32>
    %37 = vector.shape_cast %36 : vector<1x128x256xf32> to vector<128x256xf32>
    %38 = vector.shape_cast %22 : vector<128x256xf32> to vector<1x128x256xf32>
    tpu.vector_store %arg9[%c0_21, %c0_22, %c0_23], %38 {strides = array<i32>} : memref<1x128x256xf32, #tpu.memory_space<vmem>>, vector<1x128x256xf32>,
    return
  }
  func.func @transform_0(%arg0: i32, %arg1: i32) -> i32 {
    %c0_i32 = arith.constant 0 : i32
    %c0_i32_0 = arith.constant 0 : i32
    return %c0_i32 : i32
  }
  func.func @transform_1(%arg0: i32, %arg1: i32) -> (i32, i32, i32) {
    %c0_i32 = arith.constant 0 : i32
    %c0_i32_0 = arith.constant 0 : i32
    %c0_i32_1 = arith.constant 0 : i32
    return %arg0, %c0_i32, %c0_i32_0 : i32, i32, i32
  }
  func.func @transform_2(%arg0: i32, %arg1: i32) -> (i32, i32) {
    %c0_i32 = arith.constant 0 : i32
    %c0_i32_0 = arith.constant 0 : i32
    %c0_i32_1 = arith.constant 0 : i32
    return %c0_i32, %c0_i32_0 : i32, i32
  }
  func.func @transform_3(%arg0: i32, %arg1: i32) -> (i32, i32) {
    %c0_i32 = arith.constant 0 : i32
    %c0_i32_0 = arith.constant 0 : i32
    %c0_i32_1 = arith.constant 0 : i32
    return %c0_i32, %c0_i32_0 : i32, i32
  }
  func.func @transform_4(%arg0: i32, %arg1: i32) -> (i32, i32) {
    %c0_i32 = arith.constant 0 : i32
    %c0_i32_0 = arith.constant 0 : i32
    %c0_i32_1 = arith.constant 0 : i32
    return %c0_i32, %c0_i32_0 : i32, i32
  }
  func.func @transform_5(%arg0: i32, %arg1: i32) -> (i32, i32) {
    %c0_i32 = arith.constant 0 : i32
    %c0_i32_0 = arith.constant 0 : i32
    %c0_i32_1 = arith.constant 0 : i32
    return %c0_i32, %c0_i32_0 : i32, i32
  }
  func.func @transform_6(%arg0: i32, %arg1: i32) -> (i32, i32, i32) {
    %c0_i32 = arith.constant 0 : i32
    %c0_i32_0 = arith.constant 0 : i32
    return %arg0, %arg1, %c0_i32 : i32, i32, i32
  }
  func.func @transform_7(%arg0: i32, %arg1: i32) -> (i32, i32, i32) {
    %c0_i32 = arith.constant 0 : i32
    %c0_i32_0 = arith.constant 0 : i32
    return %arg0, %arg1, %c0_i32 : i32, i32, i32
  }
}

</mosaic_0001>

<bundles_post_ra>
// kernel: tpu_custom_call.1
= control target key start
LH: loop header
LB: loop body
LE: loop exit
PB: predicated region body
PF: predicated region fallthrough
CT: control target
= control target key end

     0   :  { %s3415_s0 = inlined_call_operand.<no memory space> [shape: f32[1], index: 0, kind: input, shape index: {}]   ;;  %s3416_s1 = inlined_call_operand.vmem [shape: f32[2,256,32], index: 1, kind: input, shape index: {}]   ;;  %s3417_s2 = inlined_call_operand.vmem [shape: f32[32,32], index: 2, kind: input, shape index: {}]   ;;  %s3418_s3 = inlined_call_operand.vmem [shape: f32[1,32], index: 3, kind: input, shape index: {}]   ;;  %s3419_s4 = inlined_call_operand.vmem [shape: f32[32,32], index: 4, kind: input, shape index: {}]   ;;  %s3420_s5 = inlined_call_operand.vmem [shape: f32[1,32], index: 5, kind: input, shape index: {}]   ;;  %s3421_s6 = inlined_call_operand.vmem [shape: f32[2,256,32], index: 6, kind: output, shape index: {0}]   ;;  %s3422_s7 = inlined_call_operand.hbm [shape: f32[2,256,256], index: 7, kind: output, shape index: {1}]  }
   0x1   :  { %3424 = sst [smem:[#allocation6_spill]] %s3416_s1 }
   0x2   :  { %3425 = sst [smem:[#allocation7_spill]] %s3417_s2 }
   0x3   :  { %3426 = sst [smem:[#allocation8_spill]] %s3418_s3 }
   0x4   :  { %13 = sst [smem:[#allocation2]] %s3415_s0 }
   0x5   :  { %14 = vsyncpa [#allocation4], 0 }
   0x6   :  { %16 = vsyncpa [#allocation4 + $0x1], 0  ;;  %s2555_s26 = smov 0   ;;  %s2557_s27 = smov 0  }
   0x7   :  { %s2559_s28 = smov 0   ;;  %s2561_s29 = smov 0  }
   0x8   :  { %s2563_s30 = smov 0   ;;  %s2565_s8 = smov 0  }
   0x9   :  { %s2567_s9 = smov 0   ;;  %s2569_s10 = smov 0  }
   0xa LB: > { %s1725_s0 = sadd.s32 4294967295, %s2507_s10   ;;  %s1726_s11 = sadd.s32 4294967294, %s2507_s10   ;;  %s2507_s10 = sphi %s2569_s10, %s22_s10   ;;  %s2503_s9 = sphi %s2567_s9, %s3441_s9   ;;  %s2499_s8 = sphi %s2565_s8, %s3440_s8   ;;  %s2495_s30 = sphi %s2563_s30, %s3439_s30   ;;  %s2491_s29 = sphi %s2561_s29, %s3438_s29   ;;  %s2487_s28 = sphi %s2559_s28, %s3437_s28   ;;  %s2483_s27 = sphi %s2557_s27, %s3436_s27   ;;  %s2479_s26 = sphi %s2555_s26, %s3435_s26  }
   0xb   : > { %s31_s12 = sadd.s32 1, %s2499_s8  ;;  %s34_s13 = sadd.s32 1, %s2503_s9 }
   0xc   : > { %p32_p0 = scmp.ge.s32.totalorder %s31_s12, 2  ;;  %p212_p1 = scmp.ne.s32.totalorder %s2487_s28, %s2483_s27 }
   0xd   : > { %p213_p2 = scmp.eq.s32.totalorder %s1725_s0, 3  ;;  %p218_p5 = scmp.ne.s32.totalorder %s2483_s27, %s2479_s26 }
   0xe   : > { %s3443_s12 = smov (%p32_p0, %s31_s12), 0  ;;  %s3445_s13 = smov (!%p32_p0, %s34_s13), %s2503_s9 }
   0xf   : > { %s198_s14 = ssub.s32 %s2499_s8, %s3443_s12  ;;  %p2606_p3 = por %p213_p2, %p212_p1 }
  0x10   : > { %p36_p4 = scmp.ge.s32.totalorder %s3445_s13, 2  ;;  %p219_p6 = scmp.eq.s32.totalorder %s1726_s11, 3 }
  0x11   : > { %p1729_p7 = scmp.ge.s32.totalorder %s2507_s10, 1  ;;  %p260_p9 = scmp.lt.s32.totalorder %s2507_s10, 5 }
  0x12   : > { %s3447_s13 = smov (%p36_p4, %s3445_s13), 0  ;;  %p2615_p8 = por %p219_p6, %p218_p5 }
  0x13   : > { %s197_s17 = ssub.s32 %s2503_s9, %s3447_s13  ;;  %s202_s18 = sadd.s32 1, %s2487_s28 }
  0x14   : > { %s199_s19 = sor.u32 %s198_s14, %s197_s17  ;;  %p261_p10 = pnand %p1729_p7, %p260_p9 }
  0x15   : > { %p200_p11 = scmp.eq.s32.totalorder %s199_s19, 0  ;;  %s3429_s2 = sld [smem:[#allocation7_spill]] (!%p261_p10)  ;;  %vm378_vm0 = vcmask (!%p261_p10), 261120  }
  0x16   : > { %264 = sbr.rel (%p261_p10) target bundleno = 1065 (0x429), region = 44  ;;  %p301_p12 = scmp.lt.s32.totalorder (!%p261_p10), %s2495_s30, 1  ;;  %vm2651_vm1 = vmpackc.low (!%p261_p10), %vm378_vm0, %vm378_vm0 }
  0x17   : > { %s2624_s20 = scalar_select %p200_p11, %s2487_s28, %s202_s18  }
  0x18   : > { %s1736_s18 = sshll.u32 (!%p261_p10), %s2491_s29, 7  ;;  %s3430_s1 = sld [smem:[#allocation6_spill]] (!%p261_p10) }
  0x19   : > { %s3433_s3 = sld [smem:[#allocation8_spill]] (!%p261_p10)  ;;  %s3423_s14 = sand.u32 (!%p261_p10), 1, %s2483_s27  }
  0x1a   : > { %s1843_s21 = sshll.u32 (!%p261_p10), %s2491_s29, 5  ;;  %s1838_s22 = sshll.u32 (!%p261_p10), %s2495_s30, 6 }
  0x1b   : > { %v367_v0 = vld [vmem:[%s3429_s2] sm:$0xff] (!%p261_p10)  ;;  %v368_v1 = vld [vmem:[%s3429_s2 + $0x8] sm:$0xff] (!%p261_p10)  ;;  %v369_v2 = vld [vmem:[%s3429_s2 + $0x10] sm:$0xff] (!%p261_p10) }
  0x1c   : > { %v2132_v3 = vpack.c.bf16 (!%p261_p10), %v368_v1, %v367_v0  ;;  %v370_v4 = vld [vmem:[%s3429_s2 + $0x18] sm:$0xff] (!%p261_p10) }
  0x1d   : > { %v2136_v5 = vpack.c.bf16 %v370_v4, %v369_v2  ;;  %s2640_s17 = scalar_select %p301_p12, %s2495_s30, 1 }
  0x1e   : > { %2133 = vmatprep.subr.bf16.mxu1 %v2132_v3  ;;  %s2509_s30 = smov [#allocation3]  }
  0x1f   : > { %2135 = vmatpush3.bf16.msra.mxu1 %v2132_v3  ;;  %s1842_s19 = sshll.u32 %s2640_s17, 8  ;;  %v2859_v6 = vld [vmem:[%s3433_s3] ss:$0 sm:$0xff] }
  0x20   : > { %2137 = vmatprep.subr.bf16.mxu1 %v2136_v5  ;;  %s2647_s23 = scalar_lea.vmem %s3430_s1, %s1842_s19  ;;  %s3434_s1 = sand.u32 1, %s2483_s27  }
  0x21   : > { %s2656_s24 = scalar_lea.vmem %s2647_s23, %s1736_s18  ;;  %v2659_v7 = vld [vmem:[%s2647_s23 + $0x80] sm:$0xff]  ;;  %v2662_v8 = vld [vmem:[%s2647_s23 + $0x88] sm:$0xff]  ;;  %v2681_v16 = vld [vmem:[%s2647_s23 + $0x90] sm:$0xff]  ;;  %s1730_s18 = sshll.u32 %s3423_s14, 8 }
  0x22   : > { %v318_v9 = vld [vmem:[%s2647_s23] sm:$0xff]  ;;  %v2140_v11 = vpack.c.bf16 %v2662_v8, %v2659_v7  ;;  %v352_v12 = vld [vmem:[%s2656_s24 + $0x8] sm:$0xff]  ;;  %v353_v13 = vld [vmem:[%s2656_s24 + $0x10] sm:$0xff]  ;;  %s3214_s19 = scalar_lea.vmem [#allocation3], %s1730_s18  ;;  %s3290_s2 = scalar_lea.sflag [#allocation4], %s3434_s1 }
  0x23   : > { %v351_v10 = vld [vmem:[%s2656_s24] sm:$0xff]  ;;  %2084 = vmatprep.mubr.msk.f32.mxu0 %vm378_vm0, %v318_v9  ;;  %2139 = vmatpush3.bf16.msra.mxu1 %v2136_v5  ;;  %v354_v14 = vld [vmem:[%s2656_s24 + $0x18] sm:$0xff]  ;;  %v2678_v15 = vld [vmem:[%s2647_s23 + $0x8] sm:$0xff]  ;;  %s1610_s0 = sshll.u32 %s3214_s19, 4  ;;  %s3286_s0 = int_to_ptr.vmem [resolvable:$true] %s1610_s0 }
  0x24   : > { %2052 = vmatprep.mubr.msk.f32.mxu1 %vm378_vm0, %v351_v10  ;;  %2142 = vmatprep.subr.msk.bf16.mxu1 %vm2651_vm1, %v2140_v11  ;;  %v355_v17 = vld [vmem:[%s2656_s24 + $0x20] sm:$0xff]  ;;  %v2143_v18 = vpack.c.bf16 %v2678_v15, %v318_v9  ;;  %v2686_v19 = vld [vmem:[%s2647_s23 + $0x98] sm:$0xff]  ;;  %v356_v21 = vld [vmem:[%s2656_s24 + $0x28] sm:$0xff]  ;;  %s2413_s3 = scalar_lea.vmem %s3286_s0, 4096 }
  0x25   : > { %v2146_v20 = vpack.c.bf16 %v2686_v19, %v2681_v16  ;;  %v357_v22 = vld [vmem:[%s2656_s24 + $0x30] sm:$0xff]  ;;  %v2702_v24 = vld [vmem:[%s2647_s23 + $0x18] sm:$0xff]  ;;  %v2706_v25 = vld [vmem:[%s2647_s23 + $0xa0] sm:$0xff]  ;;  %p2414_p13 = scmp.ne.s32.totalorder %s3286_s0, %s2413_s3 }
  0x26   : > { %2053 = vmatmul.mubr.msk.f32.vlgmr.msra.gmra.mrb[0].mxu1 %vm378_vm0, %v352_v12  ;;  %v2699_v23 = vld [vmem:[%s2647_s23 + $0x10] sm:$0xff]  ;;  %v2709_v26 = vld [vmem:[%s2647_s23 + $0xa8] sm:$0xff]  ;;  %v358_v27 = vld [vmem:[%s2656_s24 + $0x38] sm:$0xff] }
  0x27   : > { %2055 = vmatprep.mubr.msk.f32.mxu1 %vm378_vm0, %v353_v13  ;;  %v359_v28 = vld [vmem:[%s2656_s24 + $0x40] sm:$0xff]  ;;  %v2149_v29 = vpack.c.bf16 %v2702_v24, %v2699_v23  ;;  %v2152_v30 = vpack.c.bf16 %v2709_v26, %v2706_v25  ;;  %v360_v31 = vld [vmem:[%s2656_s24 + $0x48] sm:$0xff]  ;;  %v361_v32 = vld [vmem:[%s2656_s24 + $0x50] sm:$0xff]  ;;  %p2415_p0 = pnand %p2414_p13, %p2606_p3 }
  0x28   : > { %v2727_v33 = vld [vmem:[%s2647_s23 + $0x20] sm:$0xff]  ;;  %v2730_v34 = vld [vmem:[%s2647_s23 + $0x28] sm:$0xff]  ;;  %v2734_v35 = vld [vmem:[%s2647_s23 + $0xb0] sm:$0xff] }
  0x29   : > { %v2737_v36 = vld [vmem:[%s2647_s23 + $0xb8] sm:$0xff]  ;;  %v363_v38 = vld [vmem:[%s2656_s24 + $0x60] sm:$0xff]  ;;  %v2155_v39 = vpack.c.bf16 %v2730_v34, %v2727_v33  ;;  %v364_v41 = vld [vmem:[%s2656_s24 + $0x68] sm:$0xff]  ;;  %p2416_p1 = pneg %p2415_p0 }
  0x2a   : > { %2056 = vmatmul.mubr.msk.f32.gmra.mrb[2].mxu1 %vm378_vm0, %v354_v14  ;;  %v362_v37 = vld [vmem:[%s2656_s24 + $0x58] sm:$0xff]  ;;  %v2158_v40 = vpack.c.bf16 %v2737_v36, %v2734_v35  ;;  %v365_v42 = vld [vmem:[%s2656_s24 + $0x70] sm:$0xff]  ;;  %v2758_v45 = vld [vmem:[%s2647_s23 + $0xc0] sm:$0xff] }
  0x2b   : > { %2058 = vmatprep.mubr.msk.f32.mxu1 %vm378_vm0, %v355_v17  ;;  %v324_v43 = vld [vmem:[%s2647_s23 + $0x30] sm:$0xff]  ;;  %v325_v44 = vld [vmem:[%s2647_s23 + $0x38] sm:$0xff]  ;;  %v2761_v46 = vld [vmem:[%s2647_s23 + $0xc8] sm:$0xff] }
  0x2c   : > { %2145 = vmatpush3.bf16.xpose.msk.msra.mxu1 %vm2651_vm1, %v2143_v18  ;;  %v366_v47 = vld [vmem:[%s2656_s24 + $0x78] sm:$0xff]  ;;  %v2161_v48 = vpack.c.bf16 %v325_v44, %v324_v43  ;;  %v2164_v49 = vpack.c.bf16 %v2761_v46, %v2758_v45  ;;  %v326_v50 = vld [vmem:[%s2647_s23 + $0x40] sm:$0xff]  ;;  %v327_v51 = vld [vmem:[%s2647_s23 + $0x48] sm:$0xff] }
  0x2d   : > { %2148 = vmatprep.subr.msk.bf16.mxu1 %vm2651_vm1, %v2146_v20  ;;  %v344_v52 = vld [vmem:[%s2647_s23 + $0xd0] sm:$0xff]  ;;  %v2776_v53 = vld [vmem:[%s2647_s23 + $0xd8] sm:$0xff]  ;;  %v2167_v54 = vpack.c.bf16 %v327_v51, %v326_v50  ;;  %v346_v58 = vld [vmem:[%s2647_s23 + $0xe0] sm:$0xff] }
  0x2e   : > { %2059 = vmatmul.mubr.msk.f32.gmra.mrb[4].mxu1 %vm378_vm0, %v356_v21  ;;  %v2170_v55 = vpack.c.bf16 %v2776_v53, %v344_v52  ;;  %v328_v56 = vld [vmem:[%s2647_s23 + $0x50] sm:$0xff]  ;;  %v329_v57 = vld [vmem:[%s2647_s23 + $0x58] sm:$0xff]  ;;  %v347_v59 = vld [vmem:[%s2647_s23 + $0xe8] sm:$0xff] }
  0x2f   : > { %2061 = vmatprep.mubr.msk.f32.mxu1 %vm378_vm0, %v357_v22  ;;  %v2173_v60 = vpack.c.bf16 %v329_v57, %v328_v56  ;;  %v2176_v61 = vpack.c.bf16 %v347_v59, %v346_v58  ;;  %v330_v62 = vld [vmem:[%s2647_s23 + $0x60] sm:$0xff]  ;;  %v331_v63 = vld [vmem:[%s2647_s23 + $0x68] sm:$0xff]  ;;  %v348_v0 = vld [vmem:[%s2647_s23 + $0xf0] sm:$0xff] }
  0x30   : > { %v349_v1 = vld [vmem:[%s2647_s23 + $0xf8] sm:$0xff]  ;;  %v2179_v2 = vpack.c.bf16 %v331_v63, %v330_v62  ;;  %v332_v4 = vld [vmem:[%s2647_s23 + $0x70] sm:$0xff]  ;;  %v1117_v10 = vld [vmem:[%s3419_s4] sm:$0xff] }
  0x31   : > { %v2182_v3 = vpack.c.bf16 %v349_v1, %v348_v0  ;;  %v333_v5 = vld [vmem:[%s2647_s23 + $0x78] sm:$0xff]  ;;  %v1118_v11 = vld [vmem:[%s3419_s4 + $0x8] sm:$0xff]  ;;  %v1119_v12 = vld [vmem:[%s3419_s4 + $0x10] sm:$0xff]  ;;  %s1607_s23 = sadd.s32 %s1843_s21, %s1838_s22 }
  0x32   : > { %2062 = vmatmul.mubr.msk.f32.gmra.mrb[6].mxu1 %vm378_vm0, %v358_v27  ;;  %v2185_v9 = vpack.c.bf16 %v333_v5, %v332_v4  ;;  %v2188_v13 = vpack.c.bf16 %v1118_v11, %v1117_v10  ;;  %v1120_v14 = vld [vmem:[%s3419_s4 + $0x18] sm:$0xff]  ;;  %s1839_s25 = sshll.u32 %s1607_s23, 7 }
  0x33   : > { %2064 = vmatprep.mubr.msk.f32.mxu1 %vm378_vm0, %v359_v28  ;;  %v2192_v17 = vpack.c.bf16 %v1120_v14, %v1119_v12  ;;  %s3284_s14 = scalar_lea.hbm %s3422_s7, %s1839_s25 }
  0x34   : > { %2151 = vmatpush3.bf16.xpose.msk.msra.mxu1 %vm2651_vm1, %v2149_v29  ;;  %2189 = vmatprep.subr.bf16.mxu0 %v2188_v13 }
  0x35   : > { %2154 = vmatprep.subr.msk.bf16.mxu1 %vm2651_vm1, %v2152_v30  ;;  %2191 = vmatpush3.bf16.msra.mxu0 %v2188_v13 }
  0x36   : > { %2065 = vmatmul.mubr.msk.f32.gmra.mrb[8].mxu1 %vm378_vm0, %v360_v31  ;;  %2193 = vmatprep.subr.bf16.mxu0 %v2192_v17 }
  0x37   : > { %2067 = vmatprep.mubr.msk.f32.mxu1 %vm378_vm0, %v361_v32 }
  0x39   : > { %2195 = vmatpush3.bf16.msra.mxu0 %v2192_v17 }
  0x3a   : > { %2068 = vmatmul.mubr.msk.f32.gmra.mrb[10].mxu1 %vm378_vm0, %v362_v37 }
  0x3b   : > { %2070 = vmatprep.mubr.msk.f32.mxu1 %vm378_vm0, %v363_v38 }
  0x3c   : > { %2157 = vmatpush3.bf16.xpose.msk.msra.mxu1 %vm2651_vm1, %v2155_v39  ;;  %2085 = vmatmul.mubr.msk.f32.vlgmr.msra.gmra.mrb[0].mxu0 %vm378_vm0, %v2678_v15 }
  0x3d   : > { %2160 = vmatprep.subr.msk.bf16.mxu1 %vm2651_vm1, %v2158_v40  ;;  %2087 = vmatprep.mubr.msk.f32.mxu0 %vm378_vm0, %v2699_v23 }
  0x3e   : > { %2071 = vmatmul.mubr.msk.f32.gmra.mrb[12].mxu1 %vm378_vm0, %v364_v41 }
  0x3f   : > { %2073 = vmatprep.mubr.msk.f32.mxu1 %vm378_vm0, %v365_v42 }
  0x40   : > { %2088 = vmatmul.mubr.msk.f32.gmra.mrb[2].mxu0 %vm378_vm0, %v2702_v24 }
  0x41   : > { %2090 = vmatprep.mubr.msk.f32.mxu0 %vm378_vm0, %v2727_v33 }
  0x42   : > { %2074 = vmatmul.mubr.msk.f32.gmra.mrb[14].mxu1 %vm378_vm0, %v366_v47 }
  0x44   : > { %2163 = vmatpush3.bf16.xpose.msk.msra.mxu1 %vm2651_vm1, %v2161_v48  ;;  %2091 = vmatmul.mubr.msk.f32.gmra.mrb[4].mxu0 %vm378_vm0, %v2730_v34 }
  0x45   : > { %2166 = vmatprep.subr.msk.bf16.mxu1 %vm2651_vm1, %v2164_v49  ;;  %2093 = vmatprep.mubr.msk.f32.mxu0 %vm378_vm0, %v324_v43 }
  0x48   : > { %2094 = vmatmul.mubr.msk.f32.gmra.mrb[6].mxu0 %vm378_vm0, %v325_v44 }
  0x49   : > { %2096 = vmatprep.mubr.msk.f32.mxu0 %vm378_vm0, %v326_v50 }
  0x4c   : > { %2169 = vmatpush3.bf16.xpose.msk.msra.mxu1 %vm2651_vm1, %v2167_v54  ;;  %2097 = vmatmul.mubr.msk.f32.gmra.mrb[8].mxu0 %vm378_vm0, %v327_v51 }
  0x4d   : > { %2172 = vmatprep.subr.msk.bf16.mxu1 %vm2651_vm1, %v2170_v55  ;;  %2099 = vmatprep.mubr.msk.f32.mxu0 %vm378_vm0, %v328_v56 }
  0x50   : > { %2100 = vmatmul.mubr.msk.f32.gmra.mrb[10].mxu0 %vm378_vm0, %v329_v57 }
  0x51   : > { %2102 = vmatprep.mubr.msk.f32.mxu0 %vm378_vm0, %v330_v62 }
  0x54   : > { %2175 = vmatpush3.bf16.xpose.msk.msra.mxu1 %vm2651_vm1, %v2173_v60  ;;  %2103 = vmatmul.mubr.msk.f32.gmra.mrb[12].mxu0 %vm378_vm0, %v331_v63 }
  0x55   : > { %2178 = vmatprep.subr.msk.bf16.mxu1 %vm2651_vm1, %v2176_v61  ;;  %2105 = vmatprep.mubr.msk.f32.mxu0 %vm378_vm0, %v332_v4 }
  0x58   : > { %2106 = vmatmul.mubr.msk.f32.gmra.mrb[14].mxu0 %vm378_vm0, %v333_v5 }
  0x59   : > { %2108 = vmatprep.mubr.msk.f32.mxu0 %vm378_vm0, %v2659_v7 }
  0x5c   : > { %2181 = vmatpush3.bf16.xpose.msk.msra.mxu1 %vm2651_vm1, %v2179_v2  ;;  %2109 = vmatmul.mubr.msk.f32.gmra.mrb[16].mxu0 %vm378_vm0, %v2662_v8 }
  0x5d   : > { %2184 = vmatprep.subr.msk.bf16.mxu1 %vm2651_vm1, %v2182_v3  ;;  %2111 = vmatprep.mubr.msk.f32.mxu0 %vm378_vm0, %v2681_v16 }
  0x60   : > { %2112 = vmatmul.mubr.msk.f32.gmra.mrb[18].mxu0 %vm378_vm0, %v2686_v19 }
  0x61   : > { %2114 = vmatprep.mubr.msk.f32.mxu0 %vm378_vm0, %v2706_v25 }
  0x64   : > { %2187 = vmatpush3.bf16.xpose.msk.msra.mxu1 %vm2651_vm1, %v2185_v9  ;;  %2115 = vmatmul.mubr.msk.f32.gmra.mrb[20].mxu0 %vm378_vm0, %v2709_v26 }
  0x65   : > { %2117 = vmatprep.mubr.msk.f32.mxu0 %vm378_vm0, %v2734_v35 }
  0x68   : > { %2118 = vmatmul.mubr.msk.f32.gmra.mrb[22].mxu0 %vm378_vm0, %v2737_v36 }
  0x69   : > { %2120 = vmatprep.mubr.msk.f32.mxu0 %vm378_vm0, %v2758_v45 }
  0x6c   : > { %2121 = vmatmul.mubr.msk.f32.gmra.mrb[24].mxu0 %vm378_vm0, %v2761_v46 }
  0x6d   : > { %2123 = vmatprep.mubr.msk.f32.mxu0 %vm378_vm0, %v344_v52 }
  0x70   : > { %2124 = vmatmul.mubr.msk.f32.gmra.mrb[26].mxu0 %vm378_vm0, %v2776_v53 }
  0x71   : > { %2126 = vmatprep.mubr.msk.f32.mxu0 %vm378_vm0, %v346_v58 }
  0x74   : > { %2127 = vmatmul.mubr.msk.f32.gmra.mrb[28].mxu0 %vm378_vm0, %v347_v59 }
  0x75   : > { %2129 = vmatprep.mubr.msk.f32.mxu0 %vm378_vm0, %v348_v0 }
  0x78   : > { %2130 = vmatmul.mubr.msk.f32.gmra.mrb[30].mxu0 %vm378_vm0, %v349_v1 }
  0xf9   : > { %v2054_v7 = vpop.f32.mrb[0].mxu1 }
  0xfa   : > { %v493_v8 = vpop.f32.mrb[1].mxu1  ;;  %v499_v16 = vadd.f32 %v2054_v7, %v2859_v6 }
  0xfb   : > { %v494_v15 = vadd.f32 %v2859_v6, %v493_v8 }
  0xfd   : > { %1896 = vmatprep.mubr.msk.f32.mxu1 %vm378_vm0, %v494_v15  ;;  %v2057_v18 = vpop.f32.mrb[2].mxu1 }
  0xfe   : > { %1897 = vmatmul.mubr.msk.f32.vlgmr.msra.gmra.mrb[16].mxu1 %vm378_vm0, %v494_v15  ;;  %v503_v19 = vpop.f32.mrb[3].mxu1  ;;  %v509_v23 = vadd.f32 %v2057_v18, %v2859_v6 }
  0xff   : > { %1898 = vmatprep.mubr.msk.f32.mxu1 %vm378_vm0, %v499_v16  ;;  %v504_v20 = vadd.f32 %v2859_v6, %v503_v19 }
 0x101   : > { %v2060_v21 = vpop.f32.mrb[4].mxu1 }
 0x102   : > { %1899 = vmatmul.mubr.msk.f32.gmra.mrb[18].mxu1 %vm378_vm0, %v499_v16  ;;  %v513_v22 = vpop.f32.mrb[5].mxu1  ;;  %v519_v29 = vadd.f32 %v2060_v21, %v2859_v6 }
 0x103   : > { %1900 = vmatprep.mubr.msk.f32.mxu1 %vm378_vm0, %v504_v20  ;;  %v514_v26 = vadd.f32 %v2859_v6, %v513_v22 }
 0x105   : > { %v2063_v24 = vpop.f32.mrb[6].mxu1 }
 0x106   : > { %1901 = vmatmul.mubr.msk.f32.gmra.mrb[20].mxu1 %vm378_vm0, %v504_v20  ;;  %v523_v25 = vpop.f32.mrb[7].mxu1  ;;  %v529_v35 = vadd.f32 %v2063_v24, %v2859_v6 }
 0x107   : > { %1902 = vmatprep.mubr.msk.f32.mxu1 %vm378_vm0, %v509_v23  ;;  %v524_v32 = vadd.f32 %v2859_v6, %v523_v25 }
 0x109   : > { %v2066_v27 = vpop.f32.mrb[8].mxu1 }
 0x10a   : > { %1903 = vmatmul.mubr.msk.f32.gmra.mrb[22].mxu1 %vm378_vm0, %v509_v23  ;;  %v533_v28 = vpop.f32.mrb[9].mxu1  ;;  %v539_v39 = vadd.f32 %v2066_v27, %v2859_v6 }
 0x10b   : > { %1904 = vmatprep.mubr.msk.f32.mxu1 %vm378_vm0, %v514_v26  ;;  %v534_v38 = vadd.f32 %v2859_v6, %v533_v28 }
 0x10d   : > { %v2069_v30 = vpop.f32.mrb[10].mxu1 }
 0x10e   : > { %1905 = vmatmul.mubr.msk.f32.gmra.mrb[24].mxu1 %vm378_vm0, %v514_v26  ;;  %v543_v31 = vpop.f32.mrb[11].mxu1  ;;  %v549_v41 = vadd.f32 %v2069_v30, %v2859_v6 }
 0x10f   : > { %1906 = vmatprep.mubr.msk.f32.mxu1 %vm378_vm0, %v519_v29  ;;  %v544_v40 = vadd.f32 %v2859_v6, %v543_v31  ;;  %v2086_v30 = vpop.f32.mrb[0].mxu0  ;;  %v3014_v31 = vld [vmem:[%s3420_s5] ss:$0 sm:$0xff] }
 0x111   : > { %v2072_v33 = vpop.f32.mrb[12].mxu1 }
 0x112   : > { %1907 = vmatmul.mubr.msk.f32.gmra.mrb[26].mxu1 %vm378_vm0, %v519_v29  ;;  %v553_v34 = vpop.f32.mrb[13].mxu1  ;;  %v559_v43 = vadd.f32 %v2072_v33, %v2859_v6  ;;  %v1194_v33 = vpop.f32.mrb[1].mxu0 }
 0x113   : > { %1908 = vmatprep.mubr.msk.f32.mxu1 %vm378_vm0, %v524_v32  ;;  %v554_v42 = vadd.f32 %v2859_v6, %v553_v34  ;;  %v1195_v34 = vadd.f32 %v3014_v31, %v1194_v33 }
 0x115   : > { %v2075_v36 = vpop.f32.mrb[14].mxu1 }
 0x116   : > { %1909 = vmatmul.mubr.msk.f32.gmra.mrb[28].mxu1 %vm378_vm0, %v524_v32  ;;  %v563_v37 = vpop.f32.mrb[15].mxu1  ;;  %v569_v45 = vadd.f32 %v2075_v36, %v2859_v6  ;;  %v1200_v32 = vadd.f32 %v2086_v30, %v3014_v31 }
 0x117   : > { %1910 = vmatprep.mubr.msk.f32.mxu1 %vm378_vm0, %v529_v35  ;;  %v564_v44 = vadd.f32 %v2859_v6, %v563_v37 }
 0x11a   : > { %1911 = vmatmul.mubr.msk.f32.gmra.mrb[30].mxu1 %vm378_vm0, %v529_v35  ;;  %v2089_v35 = vpop.f32.mrb[2].mxu0 }
 0x11b   : > { %1912 = vmatprep.mubr.msk.f32.mxu1 %vm378_vm0, %v534_v38  ;;  %v3019_v36 = vadd.f32 %v2089_v35, %v3014_v31  ;;  %v1204_v37 = vpop.f32.mrb[3].mxu0 }
 0x11e   : > { %1913 = vmatmul.mubr.msk.f32.gmra.mrb[32].mxu1 %vm378_vm0, %v534_v38  ;;  %v2198_v38 = vpack.c.bf16 %v1200_v32, %v1195_v34 }
 0x11f   : > { %1914 = vmatprep.mubr.msk.f32.mxu1 %vm378_vm0, %v539_v39 }
 0x122   : > { %1915 = vmatmul.mubr.msk.f32.gmra.mrb[34].mxu1 %vm378_vm0, %v539_v39  ;;  %v1205_v39 = vadd.f32 %v3014_v31, %v1204_v37 }
 0x123   : > { %1916 = vmatprep.mubr.msk.f32.mxu1 %vm378_vm0, %v544_v40 }
 0x126   : > { %1917 = vmatmul.mubr.msk.f32.gmra.mrb[36].mxu1 %vm378_vm0, %v544_v40  ;;  %v2092_v40 = vpop.f32.mrb[4].mxu0 }
 0x127   : > { %1918 = vmatprep.mubr.msk.f32.mxu1 %vm378_vm0, %v549_v41 }
 0x12a   : > { %1919 = vmatmul.mubr.msk.f32.gmra.mrb[38].mxu1 %vm378_vm0, %v549_v41  ;;  %v3023_v41 = vadd.f32 %v2092_v40, %v3014_v31 }
 0x12b   : > { %1920 = vmatprep.mubr.msk.f32.mxu1 %vm378_vm0, %v554_v42 }
 0x12e   : > { %1921 = vmatmul.mubr.msk.f32.gmra.mrb[40].mxu1 %vm378_vm0, %v554_v42  ;;  %v1214_v42 = vpop.f32.mrb[5].mxu0 }
 0x12f   : > { %1922 = vmatprep.mubr.msk.f32.mxu1 %vm378_vm0, %v559_v43 }
 0x132   : > { %1923 = vmatmul.mubr.msk.f32.gmra.mrb[42].mxu1 %vm378_vm0, %v559_v43  ;;  %v2202_v43 = vpack.c.bf16 %v3019_v36, %v1205_v39 }
 0x133   : > { %1924 = vmatprep.mubr.msk.f32.mxu1 %vm378_vm0, %v564_v44 }
 0x136   : > { %1925 = vmatmul.mubr.msk.f32.gmra.mrb[44].mxu1 %vm378_vm0, %v564_v44  ;;  %v3027_v44 = vadd.f32 %v3014_v31, %v1214_v42 }
 0x137   : > { %1926 = vmatprep.mubr.msk.f32.mxu1 %vm378_vm0, %v569_v45 }
 0x13a   : > { %1927 = vmatmul.mubr.msk.f32.gmra.mrb[46].mxu1 %vm378_vm0, %v569_v45  ;;  %v2095_v45 = vpop.f32.mrb[6].mxu0 }
 0x1d1   : > { %v2915_v46 = vpop.f32.mrb[16].mxu1 }
 0x1d2   : > { %v2917_v47 = vpop.f32.mrb[17].mxu1 }
 0x1d3   : > { %v877_v48 = vmax.f32 %v2915_v46, %v2917_v47 }
 0x1d5   : > { %878 = vmax.xlane.f32.xlu0 %v877_v48  ;;  %v2921_v49 = vpop.f32.mrb[18].mxu1  ;;  %v3030_v48 = vadd.f32 %v2095_v45, %v3014_v31 }
 0x1d6   : > { %v2923_v50 = vpop.f32.mrb[19].mxu1 }
 0x1d7   : > { %v880_v51 = vmax.f32 %v2921_v49, %v2923_v50 }
 0x1d9   : > { %881 = vmax.xlane.f32.xlu0 %v880_v51  ;;  %v2927_v52 = vpop.f32.mrb[20].mxu1  ;;  %v1224_v51 = vpop.f32.mrb[7].mxu0 }
 0x1da   : > { %v2929_v53 = vpop.f32.mrb[21].mxu1 }
 0x1db   : > { %v883_v54 = vmax.f32 %v2927_v52, %v2929_v53 }
 0x1dd   : > { %884 = vmax.xlane.f32.xlu1 %v883_v54  ;;  %v2933_v55 = vpop.f32.mrb[22].mxu1  ;;  %v2206_v54 = vpack.c.bf16 %v3023_v41, %v3027_v44 }
 0x1de   : > { %v2935_v56 = vpop.f32.mrb[23].mxu1 }
 0x1df   : > { %v886_v57 = vmax.f32 %v2933_v55, %v2935_v56 }
 0x1e1   : > { %887 = vmax.xlane.f32.xlu1 %v886_v57  ;;  %v2939_v58 = vpop.f32.mrb[24].mxu1  ;;  %v3035_v57 = vadd.f32 %v3014_v31, %v1224_v51 }
 0x1e2   : > { %v2941_v59 = vpop.f32.mrb[25].mxu1 }
 0x1e3   : > { %v889_v60 = vmax.f32 %v2939_v58, %v2941_v59 }
 0x1e5   : > { %890 = vmax.xlane.f32.xlu0 %v889_v60  ;;  %v2945_v61 = vpop.f32.mrb[26].mxu1  ;;  %v2098_v60 = vpop.f32.mrb[8].mxu0 }
 0x1e6   : > { %v2947_v62 = vpop.f32.mrb[27].mxu1 }
 0x1e7   : > { %v892_v63 = vmax.f32 %v2945_v61, %v2947_v62 }
 0x1e9   : > { %893 = vmax.xlane.f32.xlu1 %v892_v63  ;;  %v2951_v0 = vpop.f32.mrb[28].mxu1  ;;  %v3038_v63 = vadd.f32 %v2098_v60, %v3014_v31 }
 0x1ea   : > { %v2953_v1 = vpop.f32.mrb[29].mxu1 }
 0x1eb   : > { %v895_v2 = vmax.f32 %v2951_v0, %v2953_v1 }
 0x1ed   : > { %896 = vmax.xlane.f32.xlu0 %v895_v2  ;;  %v2957_v3 = vpop.f32.mrb[30].mxu1  ;;  %v1234_v2 = vpop.f32.mrb[9].mxu0 }
 0x1ee   : > { %v2959_v4 = vpop.f32.mrb[31].mxu1 }
 0x1ef   : > { %v898_v5 = vmax.f32 %v2957_v3, %v2959_v4 }
 0x1f1   : > { %899 = vmax.xlane.f32.xlu1 %v898_v5  ;;  %v2963_v9 = vpop.f32.mrb[32].mxu1  ;;  %v2210_v5 = vpack.c.bf16 %v3030_v48, %v3035_v57 }
 0x1f2   : > { %v2965_v10 = vpop.f32.mrb[33].mxu1 }
 0x1f3   : > { %v901_v11 = vmax.f32 %v2963_v9, %v2965_v10 }
 0x1f5   : > { %902 = vmax.xlane.f32.xlu0 %v901_v11  ;;  %v2969_v12 = vpop.f32.mrb[34].mxu1  ;;  %v3043_v11 = vadd.f32 %v3014_v31, %v1234_v2 }
 0x1f6   : > { %v2971_v13 = vpop.f32.mrb[35].mxu1 }
 0x1f7   : > { %v904_v14 = vmax.f32 %v2969_v12, %v2971_v13 }
 0x1f9   : > { %905 = vmax.xlane.f32.xlu1 %v904_v14  ;;  %v2975_v17 = vpop.f32.mrb[36].mxu1  ;;  %v2101_v14 = vpop.f32.mrb[10].mxu0 }
 0x1fa   : > { %v2977_v6 = vpop.f32.mrb[37].mxu1 }
 0x1fb   : > { %v907_v7 = vmax.f32 %v2975_v17, %v2977_v6 }
 0x1fd   : > { %908 = vmax.xlane.f32.xlu0 %v907_v7  ;;  %v2981_v8 = vpop.f32.mrb[38].mxu1  ;;  %v3046_v7 = vadd.f32 %v2101_v14, %v3014_v31 }
 0x1fe   : > { %v2983_v15 = vpop.f32.mrb[39].mxu1 }
 0x1ff   : > { %v910_v16 = vmax.f32 %v2981_v8, %v2983_v15 }
 0x201   : > { %911 = vmax.xlane.f32.xlu1 %v910_v16  ;;  %v2987_v18 = vpop.f32.mrb[40].mxu1  ;;  %v1244_v16 = vpop.f32.mrb[11].mxu0 }
 0x202   : > { %v2989_v19 = vpop.f32.mrb[41].mxu1 }
 0x203   : > { %v913_v20 = vmax.f32 %v2987_v18, %v2989_v19 }
 0x205   : > { %914 = vmax.xlane.f32.xlu0 %v913_v20  ;;  %v2993_v21 = vpop.f32.mrb[42].mxu1  ;;  %v2214_v20 = vpack.c.bf16 %v3038_v63, %v3043_v11 }
 0x206   : > { %v2995_v22 = vpop.f32.mrb[43].mxu1 }
 0x207   : > { %v916_v23 = vmax.f32 %v2993_v21, %v2995_v22 }
 0x209   : > { %917 = vmax.xlane.f32.xlu1 %v916_v23  ;;  %v2999_v24 = vpop.f32.mrb[44].mxu1  ;;  %v3051_v23 = vadd.f32 %v3014_v31, %v1244_v16 }
 0x20a   : > { %v3001_v25 = vpop.f32.mrb[45].mxu1 }
 0x20b   : > { %v919_v26 = vmax.f32 %v2999_v24, %v3001_v25  ;;  %v2218_v32 = vpack.c.bf16 %v3046_v7, %v3051_v23 }
 0x20d   : > { %920 = vmax.xlane.f32.xlu0 %v919_v26  ;;  %v3005_v27 = vpop.f32.mrb[46].mxu1  ;;  %v2104_v26 = vpop.f32.mrb[12].mxu0 }
 0x20e   : > { %v3007_v28 = vpop.f32.mrb[47].mxu1  ;;  %v1254_v30 = vpop.f32.mrb[13].mxu0 }
 0x20f   : > { %v922_v29 = vmax.f32 %v3005_v27, %v3007_v28  ;;  %v1255_v33 = vadd.f32 %v3014_v31, %v1254_v30  ;;  %v2107_v34 = vpop.f32.mrb[14].mxu0 }
 0x210   : > { %v1270_v35 = vadd.f32 %v2107_v34, %v3014_v31  ;;  %v1264_v36 = vpop.f32.mrb[15].mxu0 }
 0x211   : > { %923 = vmax.xlane.f32.xlu1 %v922_v29  ;;  %v3054_v29 = vadd.f32 %v2104_v26, %v3014_v31  ;;  %v1265_v39 = vadd.f32 %v3014_v31, %v1264_v36  ;;  %v2110_v40 = vpop.f32.mrb[16].mxu0 }
 0x212   : > { %v1280_v41 = vadd.f32 %v2110_v40, %v3014_v31  ;;  %v1274_v42 = vpop.f32.mrb[17].mxu0 }
 0x213   : > { %v2222_v37 = vpack.c.bf16 %v3054_v29, %v1255_v33  ;;  %v2226_v44 = vpack.c.bf16 %v1270_v35, %v1265_v39  ;;  %v1275_v45 = vadd.f32 %v3014_v31, %v1274_v42  ;;  %v2113_v51 = vpop.f32.mrb[18].mxu0 }
 0x214   : > { %v1290_v60 = vadd.f32 %v2113_v51, %v3014_v31  ;;  %v1284_v63 = vpop.f32.mrb[19].mxu0 }
 0x215   : > { %v2196_v2 = vpack.c.bf16 %v1280_v41, %v1275_v45  ;;  %v1285_v11 = vadd.f32 %v3014_v31, %v1284_v63  ;;  %v2116_v14 = vpop.f32.mrb[20].mxu0 }
 0x216   : > { %v1300_v7 = vadd.f32 %v2116_v14, %v3014_v31  ;;  %v1294_v16 = vpop.f32.mrb[21].mxu0 }
 0x217   : > { %v2200_v23 = vpack.c.bf16 %v1290_v60, %v1285_v11  ;;  %2197 = vmatprep.subr.bf16.mxu0 %v2196_v2  ;;  %v1295_v26 = vadd.f32 %v3014_v31, %v1294_v16  ;;  %v2119_v29 = vpop.f32.mrb[22].mxu0 }
 0x218   : > { %2199 = vmatpush3.bf16.msra.mxu0 %v2198_v38  ;;  %v1310_v30 = vadd.f32 %v2119_v29, %v3014_v31  ;;  %v1304_v33 = vpop.f32.mrb[23].mxu0 }
 0x219   : > { %v2204_v34 = vpack.c.bf16 %v1300_v7, %v1295_v26  ;;  %2201 = vmatprep.subr.bf16.mxu0 %v2200_v23  ;;  %v1305_v35 = vadd.f32 %v3014_v31, %v1304_v33  ;;  %v2122_v36 = vpop.f32.mrb[24].mxu0 }
 0x21a   : > { %v1320_v39 = vadd.f32 %v2122_v36, %v3014_v31  ;;  %v1314_v40 = vpop.f32.mrb[25].mxu0 }
 0x21b   : > { %v2208_v41 = vpack.c.bf16 %v1310_v30, %v1305_v35  ;;  %v1315_v42 = vadd.f32 %v3014_v31, %v1314_v40  ;;  %v2125_v45 = vpop.f32.mrb[26].mxu0 }
 0x21c   : > { %2203 = vmatpush3.bf16.msra.mxu0 %v2202_v43  ;;  %v1330_v51 = vadd.f32 %v2125_v45, %v3014_v31  ;;  %v1324_v60 = vpop.f32.mrb[27].mxu0 }
 0x21d   : > { %2205 = vmatprep.subr.bf16.mxu0 %v2204_v34  ;;  %v2212_v38 = vpack.c.bf16 %v1320_v39, %v1315_v42  ;;  %v1325_v63 = vadd.f32 %v3014_v31, %v1324_v60  ;;  %v2128_v2 = vpop.f32.mrb[28].mxu0 }
 0x21e   : > { %v1340_v11 = vadd.f32 %v2128_v2, %v3014_v31  ;;  %v1334_v14 = vpop.f32.mrb[29].mxu0 }
 0x21f   : > { %v2216_v7 = vpack.c.bf16 %v1330_v51, %v1325_v63  ;;  %v1335_v16 = vadd.f32 %v3014_v31, %v1334_v14  ;;  %v2131_v23 = vpop.f32.mrb[30].mxu0 }
 0x220   : > { %2207 = vmatpush3.bf16.msra.mxu0 %v2206_v54  ;;  %v1350_v26 = vadd.f32 %v2131_v23, %v3014_v31  ;;  %v1344_v29 = vpop.f32.mrb[31].mxu0 }
 0x221   : > { %2209 = vmatprep.subr.bf16.mxu0 %v2208_v41  ;;  %v2220_v43 = vpack.c.bf16 %v1340_v11, %v1335_v16  ;;  %v1345_v30 = vadd.f32 %v3014_v31, %v1344_v29 }
 0x223   : > { %v2224_v33 = vpack.c.bf16 %v1350_v26, %v1345_v30 }
 0x224   : > { %2211 = vmatpush3.bf16.msra.mxu0 %v2210_v5 }
 0x225   : > { %2213 = vmatprep.subr.bf16.mxu0 %v2212_v38 }
 0x228   : > { %2215 = vmatpush3.bf16.msra.mxu0 %v2214_v20 }
 0x229   : > { %2217 = vmatprep.subr.bf16.mxu0 %v2216_v7 }
 0x22c   : > { %2219 = vmatpush3.bf16.msra.mxu0 %v2218_v32 }
 0x22d   : > { %2221 = vmatprep.subr.bf16.mxu0 %v2220_v43 }
 0x230   : > { %2223 = vmatpush3.bf16.msra.mxu0 %v2222_v37 }
 0x231   : > { %2225 = vmatprep.subr.bf16.mxu0 %v2224_v33 }
 0x234   : > { %2227 = vmatpush3.bf16.msra.mxu0 %v2226_v44 }
 0x262   : > { %v879_v54 = vpop.xlane.xlu0 %878 }
 0x263   : > { %v925_v34 = vsub.f32 %v2915_v46, %v879_v54  ;;  %v926_v35 = vsub.f32 %v2917_v47, %v879_v54 }
 0x265   : > { %v957_v36 = vmul.f32 1.442695, %v925_v34  ;;  %v959_v31 = vmul.f32 1.442695, %v926_v35 }
 0x266   : > { %v882_v39 = vpop.xlane.xlu0 %881 }
 0x267   : > { %2301 = vpow2.f32 %v957_v36  ;;  %v927_v48 = vsub.f32 %v2921_v49, %v882_v39  ;;  %v928_v57 = vsub.f32 %v2923_v50, %v882_v39 }
 0x268   : > { %2303 = vpow2.f32 %v959_v31 }
 0x269   : > { %v961_v5 = vmul.f32 1.442695, %v927_v48  ;;  %v963_v20 = vmul.f32 1.442695, %v928_v57 }
 0x26a   : > { %v885_v32 = vpop.xlane.xlu1 %884 }
 0x26b   : > { %2305 = vpow2.f32 %v961_v5  ;;  %v929_v37 = vsub.f32 %v2927_v52, %v885_v32  ;;  %v930_v44 = vsub.f32 %v2929_v53, %v885_v32 }
 0x26c   : > { %2307 = vpow2.f32 %v963_v20 }
 0x26d   : > { %v965_v46 = vmul.f32 1.442695, %v929_v37  ;;  %v967_v47 = vmul.f32 1.442695, %v930_v44 }
 0x26e   : > { %v888_v40 = vpop.xlane.xlu1 %887 }
 0x26f   : > { %2309 = vpow2.f32 %v965_v46  ;;  %v931_v41 = vsub.f32 %v2933_v55, %v888_v40  ;;  %v932_v49 = vsub.f32 %v2935_v56, %v888_v40 }
 0x270   : > { %2311 = vpow2.f32 %v967_v47 }
 0x271   : > { %v3089_v50 = vpop.eup %2301  ;;  %v969_v42 = vmul.f32 1.442695, %v931_v41  ;;  %v971_v45 = vmul.f32 1.442695, %v932_v49 }
 0x272   : > { %v3091_v51 = vpop.eup %2303  ;;  %v891_v60 = vpop.xlane.xlu0 %890 }
 0x273   : > { %2313 = vpow2.f32 %v969_v42  ;;  %v933_v52 = vsub.f32 %v2939_v58, %v891_v60  ;;  %v934_v53 = vsub.f32 %v2941_v59, %v891_v60  ;;  %v1021_v38 = vadd.f32 %v3091_v51, %v3089_v50 }
 0x274   : > { %2315 = vpow2.f32 %v971_v45 }
 0x275   : > { %v3097_v55 = vpop.eup %2305  ;;  %v973_v56 = vmul.f32 1.442695, %v933_v52  ;;  %v975_v63 = vmul.f32 1.442695, %v934_v53  ;;  %1022 = vadd.xlane.f32.xlu0 %v1021_v38 }
 0x276   : > { %v3099_v2 = vpop.eup %2307  ;;  %v894_v11 = vpop.xlane.xlu1 %893 }
 0x277   : > { %2317 = vpow2.f32 %v973_v56  ;;  %v935_v14 = vsub.f32 %v2945_v61, %v894_v11  ;;  %v936_v7 = vsub.f32 %v2947_v62, %v894_v11  ;;  %v1024_v58 = vadd.f32 %v3099_v2, %v3097_v55 }
 0x278   : > { %2319 = vpow2.f32 %v975_v63 }
 0x279   : > { %v3105_v59 = vpop.eup %2309  ;;  %v977_v16 = vmul.f32 1.442695, %v935_v14  ;;  %v979_v23 = vmul.f32 1.442695, %v936_v7  ;;  %1025 = vadd.xlane.f32.xlu1 %v1024_v58 }
 0x27a   : > { %v3107_v26 = vpop.eup %2311  ;;  %v897_v29 = vpop.xlane.xlu0 %896 }
 0x27b   : > { %2321 = vpow2.f32 %v977_v16  ;;  %v937_v43 = vsub.f32 %v2951_v0, %v897_v29  ;;  %v938_v30 = vsub.f32 %v2953_v1, %v897_v29  ;;  %v1027_v61 = vadd.f32 %v3107_v26, %v3105_v59 }
 0x27c   : > { %2323 = vpow2.f32 %v979_v23 }
 0x27d   : > { %v3113_v62 = vpop.eup %2313  ;;  %v981_v33 = vmul.f32 1.442695, %v937_v43  ;;  %v983_v54 = vmul.f32 1.442695, %v938_v30  ;;  %1028 = vadd.xlane.f32.xlu0 %v1027_v61 }
 0x27e   : > { %v3115_v34 = vpop.eup %2315  ;;  %v900_v35 = vpop.xlane.xlu1 %899 }
 0x27f   : > { %2325 = vpow2.f32 %v981_v33  ;;  %v939_v36 = vsub.f32 %v2957_v3, %v900_v35  ;;  %v940_v31 = vsub.f32 %v2959_v4, %v900_v35  ;;  %v1030_v0 = vadd.f32 %v3115_v34, %v3113_v62 }
 0x280   : > { %2327 = vpow2.f32 %v983_v54 }
 0x281   : > { %v3121_v1 = vpop.eup %2317  ;;  %v985_v39 = vmul.f32 1.442695, %v939_v36  ;;  %v987_v48 = vmul.f32 1.442695, %v940_v31  ;;  %1031 = vadd.xlane.f32.xlu1 %v1030_v0 }
 0x282   : > { %v3123_v57 = vpop.eup %2319  ;;  %v903_v5 = vpop.xlane.xlu0 %902 }
 0x283   : > { %2329 = vpow2.f32 %v985_v39  ;;  %v941_v20 = vsub.f32 %v2963_v9, %v903_v5  ;;  %v942_v32 = vsub.f32 %v2965_v10, %v903_v5  ;;  %v1033_v3 = vadd.f32 %v3123_v57, %v3121_v1 }
 0x284   : > { %2331 = vpow2.f32 %v987_v48 }
 0x285   : > { %v3129_v4 = vpop.eup %2321  ;;  %v989_v37 = vmul.f32 1.442695, %v941_v20  ;;  %v991_v44 = vmul.f32 1.442695, %v942_v32  ;;  %1034 = vadd.xlane.f32.xlu0 %v1033_v3 }
 0x286   : > { %v3131_v46 = vpop.eup %2323  ;;  %v906_v47 = vpop.xlane.xlu1 %905 }
 0x287   : > { %2333 = vpow2.f32 %v989_v37  ;;  %v943_v40 = vsub.f32 %v2969_v12, %v906_v47  ;;  %v944_v41 = vsub.f32 %v2971_v13, %v906_v47  ;;  %v1036_v9 = vadd.f32 %v3131_v46, %v3129_v4 }
 0x288   : > { %2335 = vpow2.f32 %v991_v44 }
 0x289   : > { %v3137_v10 = vpop.eup %2325  ;;  %v993_v49 = vmul.f32 1.442695, %v943_v40  ;;  %v995_v42 = vmul.f32 1.442695, %v944_v41  ;;  %1037 = vadd.xlane.f32.xlu1 %v1036_v9 }
 0x28a   : > { %v3139_v45 = vpop.eup %2327  ;;  %v909_v60 = vpop.xlane.xlu0 %908 }
 0x28b   : > { %2337 = vpow2.f32 %v993_v49  ;;  %v945_v52 = vsub.f32 %v2975_v17, %v909_v60  ;;  %v946_v53 = vsub.f32 %v2977_v6, %v909_v60  ;;  %v1039_v12 = vadd.f32 %v3139_v45, %v3137_v10 }
 0x28c   : > { %2339 = vpow2.f32 %v995_v42 }
 0x28d   : > { %v3145_v13 = vpop.eup %2329  ;;  %v997_v38 = vmul.f32 1.442695, %v945_v52  ;;  %v999_v56 = vmul.f32 1.442695, %v946_v53  ;;  %1040 = vadd.xlane.f32.xlu0 %v1039_v12 }
 0x28e   : > { %v3147_v63 = vpop.eup %2331  ;;  %v912_v11 = vpop.xlane.xlu1 %911 }
 0x28f   : > { %2341 = vpow2.f32 %v997_v38  ;;  %v947_v14 = vsub.f32 %v2981_v8, %v912_v11  ;;  %v948_v7 = vsub.f32 %v2983_v15, %v912_v11  ;;  %v1042_v17 = vadd.f32 %v3147_v63, %v3145_v13 }
 0x290   : > { %2343 = vpow2.f32 %v999_v56 }
 0x291   : > { %v3153_v6 = vpop.eup %2333  ;;  %v1001_v58 = vmul.f32 1.442695, %v947_v14  ;;  %v1003_v16 = vmul.f32 1.442695, %v948_v7  ;;  %1043 = vadd.xlane.f32.xlu1 %v1042_v17 }
 0x292   : > { %v3155_v23 = vpop.eup %2335  ;;  %v915_v29 = vpop.xlane.xlu0 %914 }
 0x293   : > { %2345 = vpow2.f32 %v1001_v58  ;;  %v949_v43 = vsub.f32 %v2987_v18, %v915_v29  ;;  %v950_v30 = vsub.f32 %v2989_v19, %v915_v29  ;;  %v1045_v8 = vadd.f32 %v3155_v23, %v3153_v6 }
 0x294   : > { %2347 = vpow2.f32 %v1003_v16 }
 0x295   : > { %v3161_v15 = vpop.eup %2337  ;;  %v1005_v61 = vmul.f32 1.442695, %v949_v43  ;;  %v1007_v33 = vmul.f32 1.442695, %v950_v30  ;;  %1046 = vadd.xlane.f32.xlu0 %v1045_v8 }
 0x296   : > { %v3163_v54 = vpop.eup %2339  ;;  %v918_v35 = vpop.xlane.xlu1 %917 }
 0x297   : > { %2349 = vpow2.f32 %v1005_v61  ;;  %v951_v36 = vsub.f32 %v2993_v21, %v918_v35  ;;  %v952_v31 = vsub.f32 %v2995_v22, %v918_v35  ;;  %v1048_v18 = vadd.f32 %v3163_v54, %v3161_v15 }
 0x298   : > { %2351 = vpow2.f32 %v1007_v33 }
 0x299   : > { %v3169_v19 = vpop.eup %2341  ;;  %v1009_v0 = vmul.f32 1.442695, %v951_v36  ;;  %v1011_v39 = vmul.f32 1.442695, %v952_v31  ;;  %1049 = vadd.xlane.f32.xlu1 %v1048_v18 }
 0x29a   : > { %v3171_v48 = vpop.eup %2343  ;;  %v921_v5 = vpop.xlane.xlu0 %920 }
 0x29b   : > { %2353 = vpow2.f32 %v1009_v0  ;;  %v953_v20 = vsub.f32 %v2999_v24, %v921_v5  ;;  %v954_v32 = vsub.f32 %v3001_v25, %v921_v5  ;;  %v1051_v21 = vadd.f32 %v3171_v48, %v3169_v19 }
 0x29c   : > { %2355 = vpow2.f32 %v1011_v39 }
 0x29d   : > { %v3177_v22 = vpop.eup %2345  ;;  %v1013_v3 = vmul.f32 1.442695, %v953_v20  ;;  %v1015_v37 = vmul.f32 1.442695, %v954_v32  ;;  %1052 = vadd.xlane.f32.xlu0 %v1051_v21 }
 0x29e   : > { %v3179_v44 = vpop.eup %2347  ;;  %v924_v47 = vpop.xlane.xlu1 %923 }
 0x29f   : > { %2357 = vpow2.f32 %v1013_v3  ;;  %v955_v40 = vsub.f32 %v3005_v27, %v924_v47  ;;  %v956_v41 = vsub.f32 %v3007_v28, %v924_v47  ;;  %v1054_v24 = vadd.f32 %v3179_v44, %v3177_v22 }
 0x2a0   : > { %2359 = vpow2.f32 %v1015_v37 }
 0x2a1   : > { %v3185_v25 = vpop.eup %2349  ;;  %v1017_v9 = vmul.f32 1.442695, %v955_v40  ;;  %v1019_v49 = vmul.f32 1.442695, %v956_v41  ;;  %1055 = vadd.xlane.f32.xlu1 %v1054_v24 }
 0x2a2   : > { %v3187_v42 = vpop.eup %2351 }
 0x2a3   : > { %2361 = vpow2.f32 %v1017_v9  ;;  %v1057_v60 = vadd.f32 %v3187_v42, %v3185_v25 }
 0x2a4   : > { %2363 = vpow2.f32 %v1019_v49 }
 0x2a5   : > { %v3191_v52 = vpop.eup %2353  ;;  %1058 = vadd.xlane.f32.xlu0 %v1057_v60 }
 0x2a6   : > { %v3193_v27 = vpop.eup %2355 }
 0x2a7   : > { %v1060_v28 = vadd.f32 %v3193_v27, %v3191_v52 }
 0x2a9   : > { %v3197_v53 = vpop.eup %2357  ;;  %1061 = vadd.xlane.f32.xlu1 %v1060_v28 }
 0x2aa   : > { %v3199_v12 = vpop.eup %2359 }
 0x2ab   : > { %v1063_v38 = vadd.f32 %v3199_v12, %v3197_v53 }
 0x2ad   : > { %v3203_v56 = vpop.eup %2361  ;;  %1064 = vadd.xlane.f32.xlu0 %v1063_v38 }
 0x2ae   : > { %v3205_v11 = vpop.eup %2363 }
 0x2af   : > { %v1066_v14 = vadd.f32 %v3205_v11, %v3203_v56 }
 0x2b1   : > { %1067 = vadd.xlane.f32.xlu1 %v1066_v14 }
 0x302   : > { %v1023_v7 = vpop.xlane.xlu0 %1022 }
 0x303   : > { %2365 = vrcp.f32 %v1023_v7 }
 0x306   : > { %v1026_v17 = vpop.xlane.xlu1 %1025 }
 0x307   : > { %2367 = vrcp.f32 %v1026_v17 }
 0x30a   : > { %v1029_v58 = vpop.xlane.xlu0 %1028 }
 0x30b   : > { %2369 = vrcp.f32 %v1029_v58 }
 0x30d   : > { %v2366_v16 = vpop.eup %2365 }
 0x30e   : > { %v1085_v29 = vmul.f32 %v2366_v16, %v3089_v50  ;;  %v1032_v43 = vpop.xlane.xlu1 %1031  ;;  %v1086_v30 = vmul.f32 %v2366_v16, %v3091_v51 }
 0x30f   : > { %2371 = vrcp.f32 %v1032_v43 }
 0x310   : > { %1548 = vst [vmem:[%s3214_s19] sm:$0xff] %v1085_v29  ;;  %1417 = vmatprep.mubr.f32.mxu0 %v1086_v30  ;;  %1549 = vst [vmem:[%s3214_s19 + $0x8] sm:$0xff] %v1086_v30 }
 0x311   : > { %v2368_v8 = vpop.eup %2367  ;;  %1418 = vmatmul.mubr.f32.vlgmr.msra.gmra.mrb[32].mxu0 %v1085_v29 }
 0x312   : > { %v1035_v61 = vpop.xlane.xlu0 %1034  ;;  %v1088_v50 = vmul.f32 %v2368_v8, %v3099_v2  ;;  %v1087_v33 = vmul.f32 %v2368_v8, %v3097_v55 }
 0x313   : > { %2373 = vrcp.f32 %v1035_v61 }
 0x314   : > { %1422 = vmatprep.mubr.f32.mxu0 %v1088_v50  ;;  %1551 = vst [vmem:[%s3214_s19 + $0x18] sm:$0xff] %v1088_v50  ;;  %1550 = vst [vmem:[%s3214_s19 + $0x10] sm:$0xff] %v1087_v33 }
 0x315   : > { %v2370_v51 = vpop.eup %2369  ;;  %1423 = vmatmul.mubr.f32.gmra.mrb[34].mxu0 %v1087_v33 }
 0x316   : > { %v1038_v35 = vpop.xlane.xlu1 %1037  ;;  %v1090_v36 = vmul.f32 %v2370_v51, %v3107_v26  ;;  %v1089_v31 = vmul.f32 %v2370_v51, %v3105_v59 }
 0x317   : > { %2375 = vrcp.f32 %v1038_v35 }
 0x318   : > { %1427 = vmatprep.mubr.f32.mxu0 %v1090_v36  ;;  %1553 = vst [vmem:[%s3214_s19 + $0x28] sm:$0xff] %v1090_v36  ;;  %1552 = vst [vmem:[%s3214_s19 + $0x20] sm:$0xff] %v1089_v31 }
 0x319   : > { %v2372_v2 = vpop.eup %2371  ;;  %1428 = vmatmul.mubr.f32.gmra.mrb[36].mxu0 %v1089_v31 }
 0x31a   : > { %v1041_v55 = vpop.xlane.xlu0 %1040  ;;  %v1092_v18 = vmul.f32 %v2372_v2, %v3115_v34  ;;  %v1091_v0 = vmul.f32 %v2372_v2, %v3113_v62 }
 0x31b   : > { %2377 = vrcp.f32 %v1041_v55 }
 0x31c   : > { %1432 = vmatprep.mubr.f32.mxu0 %v1092_v18  ;;  %1555 = vst [vmem:[%s3214_s19 + $0x38] sm:$0xff] %v1092_v18  ;;  %1554 = vst [vmem:[%s3214_s19 + $0x30] sm:$0xff] %v1091_v0 }
 0x31d   : > { %v2374_v26 = vpop.eup %2373  ;;  %1433 = vmatmul.mubr.f32.gmra.mrb[38].mxu0 %v1091_v0 }
 0x31e   : > { %v1044_v59 = vpop.xlane.xlu1 %1043  ;;  %v1094_v39 = vmul.f32 %v2374_v26, %v3123_v57  ;;  %v1093_v5 = vmul.f32 %v2374_v26, %v3121_v1 }
 0x31f   : > { %2379 = vrcp.f32 %v1044_v59 }
 0x320   : > { %1437 = vmatprep.mubr.f32.mxu0 %v1094_v39  ;;  %1557 = vst [vmem:[%s3214_s19 + $0x48] sm:$0xff] %v1094_v39  ;;  %1556 = vst [vmem:[%s3214_s19 + $0x40] sm:$0xff] %v1093_v5 }
 0x321   : > { %v2376_v34 = vpop.eup %2375  ;;  %1438 = vmatmul.mubr.f32.gmra.mrb[40].mxu0 %v1093_v5 }
 0x322   : > { %v1047_v62 = vpop.xlane.xlu0 %1046  ;;  %v1096_v20 = vmul.f32 %v2376_v34, %v3131_v46  ;;  %v1095_v32 = vmul.f32 %v2376_v34, %v3129_v4 }
 0x323   : > { %2381 = vrcp.f32 %v1047_v62 }
 0x324   : > { %1442 = vmatprep.mubr.f32.mxu0 %v1096_v20  ;;  %1559 = vst [vmem:[%s3214_s19 + $0x58] sm:$0xff] %v1096_v20  ;;  %1558 = vst [vmem:[%s3214_s19 + $0x50] sm:$0xff] %v1095_v32 }
 0x325   : > { %v2378_v57 = vpop.eup %2377  ;;  %1443 = vmatmul.mubr.f32.gmra.mrb[42].mxu0 %v1095_v32 }
 0x326   : > { %v1050_v1 = vpop.xlane.xlu1 %1049  ;;  %v1098_v21 = vmul.f32 %v2378_v57, %v3139_v45  ;;  %v1097_v3 = vmul.f32 %v2378_v57, %v3137_v10 }
 0x327   : > { %2383 = vrcp.f32 %v1050_v1 }
 0x328   : > { %1447 = vmatprep.mubr.f32.mxu0 %v1098_v21  ;;  %1561 = vst [vmem:[%s3214_s19 + $0x68] sm:$0xff] %v1098_v21  ;;  %1560 = vst [vmem:[%s3214_s19 + $0x60] sm:$0xff] %v1097_v3 }
 0x329   : > { %v2380_v46 = vpop.eup %2379  ;;  %1448 = vmatmul.mubr.f32.gmra.mrb[44].mxu0 %v1097_v3 }
 0x32a   : > { %v1053_v4 = vpop.xlane.xlu0 %1052  ;;  %v1100_v37 = vmul.f32 %v2380_v46, %v3147_v63  ;;  %v1099_v47 = vmul.f32 %v2380_v46, %v3145_v13 }
 0x32b   : > { %2385 = vrcp.f32 %v1053_v4 }
 0x32c   : > { %1452 = vmatprep.mubr.f32.mxu0 %v1100_v37  ;;  %1563 = vst [vmem:[%s3214_s19 + $0x78] sm:$0xff] %v1100_v37  ;;  %1562 = vst [vmem:[%s3214_s19 + $0x70] sm:$0xff] %v1099_v47 }
 0x32d   : > { %v2382_v45 = vpop.eup %2381  ;;  %1453 = vmatmul.mubr.f32.gmra.mrb[46].mxu0 %v1099_v47 }
 0x32e   : > { %v1056_v10 = vpop.xlane.xlu1 %1055  ;;  %v1102_v40 = vmul.f32 %v2382_v45, %v3155_v23  ;;  %v1101_v41 = vmul.f32 %v2382_v45, %v3153_v6 }
 0x32f   : > { %2387 = vrcp.f32 %v1056_v10 }
 0x330   : > { %1457 = vmatprep.mubr.f32.mxu0 %v1102_v40  ;;  %1565 = vst [vmem:[%s3214_s19 + $0x88] sm:$0xff] %v1102_v40  ;;  %1564 = vst [vmem:[%s3214_s19 + $0x80] sm:$0xff] %v1101_v41 }
 0x331   : > { %v2384_v63 = vpop.eup %2383  ;;  %1458 = vmatmul.mubr.f32.gmra.mrb[48].mxu0 %v1101_v41 }
 0x332   : > { %v1059_v13 = vpop.xlane.xlu0 %1058  ;;  %v1104_v24 = vmul.f32 %v2384_v63, %v3163_v54  ;;  %v1103_v9 = vmul.f32 %v2384_v63, %v3161_v15 }
 0x333   : > { %2389 = vrcp.f32 %v1059_v13 }
 0x334   : > { %1462 = vmatprep.mubr.f32.mxu0 %v1104_v24  ;;  %1567 = vst [vmem:[%s3214_s19 + $0x98] sm:$0xff] %v1104_v24  ;;  %1566 = vst [vmem:[%s3214_s19 + $0x90] sm:$0xff] %v1103_v9 }
 0x335   : > { %v2386_v23 = vpop.eup %2385  ;;  %1463 = vmatmul.mubr.f32.gmra.mrb[50].mxu0 %v1103_v9 }
 0x336   : > { %v1062_v6 = vpop.xlane.xlu1 %1061  ;;  %v1106_v49 = vmul.f32 %v2386_v23, %v3171_v48  ;;  %v1105_v60 = vmul.f32 %v2386_v23, %v3169_v19 }
 0x337   : > { %2391 = vrcp.f32 %v1062_v6 }
 0x338   : > { %1467 = vmatprep.mubr.f32.mxu0 %v1106_v49  ;;  %1569 = vst [vmem:[%s3214_s19 + $0xa8] sm:$0xff] %v1106_v49  ;;  %1568 = vst [vmem:[%s3214_s19 + $0xa0] sm:$0xff] %v1105_v60 }
 0x339   : > { %v2388_v54 = vpop.eup %2387  ;;  %1468 = vmatmul.mubr.f32.gmra.mrb[52].mxu0 %v1105_v60 }
 0x33a   : > { %v1065_v15 = vpop.xlane.xlu0 %1064  ;;  %v1108_v28 = vmul.f32 %v2388_v54, %v3179_v44  ;;  %v1107_v38 = vmul.f32 %v2388_v54, %v3177_v22 }
 0x33b   : > { %2393 = vrcp.f32 %v1065_v15 }
 0x33c   : > { %1472 = vmatprep.mubr.f32.mxu0 %v1108_v28  ;;  %1571 = vst [vmem:[%s3214_s19 + $0xb8] sm:$0xff] %v1108_v28  ;;  %1570 = vst [vmem:[%s3214_s19 + $0xb0] sm:$0xff] %v1107_v38 }
 0x33d   : > { %v2390_v19 = vpop.eup %2389  ;;  %1473 = vmatmul.mubr.f32.gmra.mrb[54].mxu0 %v1107_v38 }
 0x33e   : > { %v1068_v48 = vpop.xlane.xlu1 %1067  ;;  %v1110_v14 = vmul.f32 %v2390_v19, %v3187_v42  ;;  %v1109_v7 = vmul.f32 %v2390_v19, %v3185_v25 }
 0x33f   : > { %2395 = vrcp.f32 %v1068_v48 }
 0x340   : > { %1477 = vmatprep.mubr.f32.mxu0 %v1110_v14  ;;  %1573 = vst [vmem:[%s3214_s19 + $0xc8] sm:$0xff] %v1110_v14  ;;  %1572 = vst [vmem:[%s3214_s19 + $0xc0] sm:$0xff] %v1109_v7 }
 0x341   : > { %v2392_v22 = vpop.eup %2391  ;;  %1478 = vmatmul.mubr.f32.gmra.mrb[56].mxu0 %v1109_v7 }
 0x342   : > { %v1112_v44 = vmul.f32 %v2392_v22, %v3193_v27  ;;  %v1111_v17 = vmul.f32 %v2392_v22, %v3191_v52 }
 0x344   : > { %1482 = vmatprep.mubr.f32.mxu0 %v1112_v44  ;;  %1575 = vst [vmem:[%s3214_s19 + $0xd8] sm:$0xff] %v1112_v44  ;;  %1574 = vst [vmem:[%s3214_s19 + $0xd0] sm:$0xff] %v1111_v17 }
 0x345   : > { %v2394_v42 = vpop.eup %2393  ;;  %1483 = vmatmul.mubr.f32.gmra.mrb[58].mxu0 %v1111_v17 }
 0x346   : > { %v1114_v25 = vmul.f32 %v2394_v42, %v3199_v12  ;;  %v1113_v58 = vmul.f32 %v2394_v42, %v3197_v53 }
 0x348   : > { %1487 = vmatprep.mubr.f32.mxu0 %v1114_v25  ;;  %1577 = vst [vmem:[%s3214_s19 + $0xe8] sm:$0xff] %v1114_v25  ;;  %1576 = vst [vmem:[%s3214_s19 + $0xe0] sm:$0xff] %v1113_v58 }
 0x349   : > { %v2396_v27 = vpop.eup %2395  ;;  %1488 = vmatmul.mubr.f32.gmra.mrb[60].mxu0 %v1113_v58 }
 0x34a   : > { %v1116_v52 = vmul.f32 %v2396_v27, %v3205_v11  ;;  %v1115_v16 = vmul.f32 %v2396_v27, %v3203_v56 }
 0x34c   : > { %1492 = vmatprep.mubr.f32.mxu0 %v1116_v52  ;;  %1579 = vst [vmem:[%s3214_s19 + $0xf8] sm:$0xff] %v1116_v52  ;;  %1578 = vst [vmem:[%s3214_s19 + $0xf0] sm:$0xff] %v1115_v16  ;;  %s2417_s19 = sshll.u32 %s2509_s30, 4  ;;  %s2418_s19 = int_to_ptr.vmem [resolvable:$false] %s2417_s19 }
 0x34d   : > { %1493 = vmatmul.mubr.f32.gmra.mrb[62].mxu0 %v1115_v16  ;;  %s2419_s21 = scalar_lea.vmem %s2418_s19, 8192  ;;  %p2420_p2 = scmp.lt.s32.totalorder %s3286_s0, %s2418_s19 }
 0x34e   : > { %p2421_p4 = scmp.lt.s32.totalorder %s2419_s21, %s2413_s3 }
 0x350   : > { %p2422_p5 = por %p2421_p4, %p2420_p2 }
 0x352   : > { %p2423_p6 = pnand %p2422_p5, %p2416_p1 }
 0x354   : > { %2426 = shalt.err (!%p2423_p6)
}
 0x355   : > { %s2427_s1 = scalar_lea.hbm %s3284_s14, 4096  ;;  %s2431_s25 = scalar_lea.hbm %s3422_s7, 16384 }
 0x356   : > { %p2428_p7 = scmp.ne.s32.totalorder %s3284_s14, %s2427_s1  ;;  %p2432_p11 = scmp.lt.u32.totalorder %s3284_s14, %s3422_s7 }
 0x357   : > { %p2433_p12 = scmp.lt.u32.totalorder %s2431_s25, %s2427_s1  ;;  %p2435_p0 = scmp.lt.u32.totalorder %s2427_s1, %s3284_s14 }
 0x358   : > { %p2429_p9 = pnand %p2428_p7, %p2606_p3 }
 0x359   : > { %p2434_p13 = por %p2433_p12, %p2432_p11 }
 0x35a   : > { %p2430_p10 = pneg %p2429_p9 }
 0x35b   : > { %p2436_p1 = por %p2435_p0, %p2434_p13 }
 0x35d   : > { %p2437_p2 = pnand %p2436_p1, %p2430_p10 }
 0x35f   : > { %2440 = shalt.err (!%p2437_p2)
}
 0x360   : > { %s2510_s3 = smov 256   ;;  %s2511_s30 = smov 16   ;;  %v2397_v8 = vld [vmem:[%s2656_s24] sm:$0xff]  ;;  %v2398_v36 = vld [vmem:[%s2656_s24 + $0x8] sm:$0xff]  ;;  %v2399_v26 = vld [vmem:[%s2656_s24 + $0x10] sm:$0xff] }
 0x361   : > { %2228 = dma.vmem_to_hbm [thread:$0]  (%p2606_p3), %s3286_s0, 4096, %s3284_s14, %s3290_s2, %s2510_s3, %s2510_s3, %s2511_s30  }
 0x362   : > { %s1733_s19 = sshll.u32 %s2491_s29, 4  ;;  %s1498_s21 = sld [smem:[#allocation2]]  ;;  %v2400_v20 = vld [vmem:[%s2656_s24 + $0x18] sm:$0xff]  ;;  %v2401_v46 = vld [vmem:[%s2656_s24 + $0x20] sm:$0xff]  ;;  %v2402_v40 = vld [vmem:[%s2656_s24 + $0x28] sm:$0xff] }
 0x363   : > { %p309_p4 = scmp.lt.s32.totalorder %s1733_s19, 31  ;;  %s1734_s22 = sshll.u32 %s2640_s17, 5  ;;  %v2403_v23 = vld [vmem:[%s2656_s24 + $0x30] sm:$0xff]  ;;  %v2404_v28 = vld [vmem:[%s2656_s24 + $0x38] sm:$0xff]  ;;  %v2405_v22 = vld [vmem:[%s2656_s24 + $0x40] sm:$0xff] }
 0x364   : > { %v2406_v27 = vld [vmem:[%s2656_s24 + $0x48] sm:$0xff] }
 0x365   : > { %s3449_s19 = smov (!%p309_p4, %s1733_s19), 31 }
 0x366   : > { %s312_s1 = sadd.s32 %s1734_s22, %s3449_s19 }
 0x367   : > { %s1735_s23 = sshll.u32 %s312_s1, 3 }
 0x368   : > { %v3316_v56 = vstv %s1498_s21  ;;  %s3322_s2 = scalar_lea.vmem %s3421_s6, %s1735_s23 }
 0x3e4   : > { %v1996_v53 = vpop.f32.mrb[32].mxu0 }
 0x3e5   : > { %v1997_v12 = vpop.f32.mrb[33].mxu0 }
 0x3e6   : > { %v1998_v11 = vadd.f32 %v1997_v12, %v1996_v53 }
 0x3e8   : > { %v1500_v29 = vmul.f32 %v1998_v11, %v3316_v56  ;;  %v1999_v43 = vpop.f32.mrb[34].mxu0 }
 0x3e9   : > { %v2000_v30 = vpop.f32.mrb[35].mxu0 }
 0x3ea   : > { %v1516_v61 = vadd.f32 %v2397_v8, %v1500_v29  ;;  %v2001_v50 = vadd.f32 %v2000_v30, %v1999_v43  ;;  %v2407_v29 = vld [vmem:[%s2656_s24 + $0x50] sm:$0xff] }
 0x3ec   : > { %1532 = vst.msk [vmem:[%s3322_s2] sm:$0xff] %vm378_vm0, %v1516_v61  ;;  %v1501_v33 = vmul.f32 %v2001_v50, %v3316_v56  ;;  %v2002_v51 = vpop.f32.mrb[36].mxu0 }
 0x3ed   : > { %v2003_v35 = vpop.f32.mrb[37].mxu0 }
 0x3ee   : > { %v1517_v31 = vadd.f32 %v2398_v36, %v1501_v33  ;;  %v2004_v2 = vadd.f32 %v2003_v35, %v2002_v51  ;;  %v2408_v33 = vld [vmem:[%s2656_s24 + $0x58] sm:$0xff] }
 0x3f0   : > { %1533 = vst.msk [vmem:[%s3322_s2 + $0x8] sm:$0xff] %vm378_vm0, %v1517_v31  ;;  %v1502_v55 = vmul.f32 %v2004_v2, %v3316_v56  ;;  %v2005_v18 = vpop.f32.mrb[38].mxu0 }
 0x3f1   : > { %v2006_v0 = vpop.f32.mrb[39].mxu0 }
 0x3f2   : > { %v1518_v59 = vadd.f32 %v2399_v26, %v1502_v55  ;;  %v2007_v39 = vadd.f32 %v2006_v0, %v2005_v18  ;;  %v2409_v55 = vld [vmem:[%s2656_s24 + $0x60] sm:$0xff] }
 0x3f4   : > { %1534 = vst.msk [vmem:[%s3322_s2 + $0x10] sm:$0xff] %vm378_vm0, %v1518_v59  ;;  %v1503_v5 = vmul.f32 %v2007_v39, %v3316_v56  ;;  %v2008_v34 = vpop.f32.mrb[40].mxu0 }
 0x3f5   : > { %v2009_v62 = vpop.f32.mrb[41].mxu0 }
 0x3f6   : > { %v1519_v32 = vadd.f32 %v2400_v20, %v1503_v5  ;;  %v2010_v57 = vadd.f32 %v2009_v62, %v2008_v34  ;;  %v2410_v5 = vld [vmem:[%s2656_s24 + $0x68] sm:$0xff] }
 0x3f8   : > { %1535 = vst.msk [vmem:[%s3322_s2 + $0x18] sm:$0xff] %vm378_vm0, %v1519_v32  ;;  %v1504_v1 = vmul.f32 %v2010_v57, %v3316_v56  ;;  %v2011_v21 = vpop.f32.mrb[42].mxu0 }
 0x3f9   : > { %v2012_v3 = vpop.f32.mrb[43].mxu0 }
 0x3fa   : > { %v1520_v4 = vadd.f32 %v2401_v46, %v1504_v1  ;;  %v2013_v37 = vadd.f32 %v2012_v3, %v2011_v21  ;;  %v2411_v1 = vld [vmem:[%s2656_s24 + $0x70] sm:$0xff] }
 0x3fc   : > { %1536 = vst.msk [vmem:[%s3322_s2 + $0x20] sm:$0xff] %vm378_vm0, %v1520_v4  ;;  %v1505_v47 = vmul.f32 %v2013_v37, %v3316_v56  ;;  %v2014_v45 = vpop.f32.mrb[44].mxu0  ;;  %v2412_v4 = vld [vmem:[%s2656_s24 + $0x78] sm:$0xff] }
 0x3fd   : > { %v2015_v10 = vpop.f32.mrb[45].mxu0 }
 0x3fe   : > { %v1521_v41 = vadd.f32 %v2402_v40, %v1505_v47  ;;  %v2016_v63 = vadd.f32 %v2015_v10, %v2014_v45 }
 0x400   : > { %1537 = vst.msk [vmem:[%s3322_s2 + $0x28] sm:$0xff] %vm378_vm0, %v1521_v41  ;;  %v1506_v13 = vmul.f32 %v2016_v63, %v3316_v56  ;;  %v2017_v24 = vpop.f32.mrb[46].mxu0 }
 0x401   : > { %v2018_v9 = vpop.f32.mrb[47].mxu0 }
 0x402   : > { %v1522_v6 = vadd.f32 %v2403_v23, %v1506_v13  ;;  %v2019_v49 = vadd.f32 %v2018_v9, %v2017_v24 }
 0x404   : > { %1538 = vst.msk [vmem:[%s3322_s2 + $0x30] sm:$0xff] %vm378_vm0, %v1522_v6  ;;  %v1507_v60 = vmul.f32 %v2019_v49, %v3316_v56  ;;  %v2020_v54 = vpop.f32.mrb[48].mxu0 }
 0x405   : > { %v2021_v15 = vpop.f32.mrb[49].mxu0 }
 0x406   : > { %v1523_v38 = vadd.f32 %v2404_v28, %v1507_v60  ;;  %v2022_v19 = vadd.f32 %v2021_v15, %v2020_v54 }
 0x408   : > { %1539 = vst.msk [vmem:[%s3322_s2 + $0x38] sm:$0xff] %vm378_vm0, %v1523_v38  ;;  %v1508_v48 = vmul.f32 %v2022_v19, %v3316_v56  ;;  %v2023_v14 = vpop.f32.mrb[50].mxu0 }
 0x409   : > { %v2024_v7 = vpop.f32.mrb[51].mxu0 }
 0x40a   : > { %v1524_v44 = vadd.f32 %v2405_v22, %v1508_v48  ;;  %v2025_v17 = vadd.f32 %v2024_v7, %v2023_v14 }
 0x40c   : > { %1540 = vst.msk [vmem:[%s3322_s2 + $0x40] sm:$0xff] %vm378_vm0, %v1524_v44  ;;  %v1509_v42 = vmul.f32 %v2025_v17, %v3316_v56  ;;  %v2026_v25 = vpop.f32.mrb[52].mxu0 }
 0x40d   : > { %v2027_v58 = vpop.f32.mrb[53].mxu0 }
 0x40e   : > { %v1525_v52 = vadd.f32 %v2406_v27, %v1509_v42  ;;  %v2028_v16 = vadd.f32 %v2027_v58, %v2026_v25 }
 0x410   : > { %1541 = vst.msk [vmem:[%s3322_s2 + $0x48] sm:$0xff] %vm378_vm0, %v1525_v52  ;;  %v1510_v53 = vmul.f32 %v2028_v16, %v3316_v56  ;;  %v2029_v12 = vpop.f32.mrb[54].mxu0 }
 0x411   : > { %v2030_v11 = vpop.f32.mrb[55].mxu0 }
 0x412   : > { %v1526_v43 = vadd.f32 %v2407_v29, %v1510_v53  ;;  %v2031_v30 = vadd.f32 %v2030_v11, %v2029_v12 }
 0x414   : > { %1542 = vst.msk [vmem:[%s3322_s2 + $0x50] sm:$0xff] %vm378_vm0, %v1526_v43  ;;  %v1511_v8 = vmul.f32 %v2031_v30, %v3316_v56  ;;  %v2032_v61 = vpop.f32.mrb[56].mxu0 }
 0x415   : > { %v2033_v50 = vpop.f32.mrb[57].mxu0 }
 0x416   : > { %v1527_v51 = vadd.f32 %v2408_v33, %v1511_v8  ;;  %v2034_v35 = vadd.f32 %v2033_v50, %v2032_v61 }
 0x418   : > { %1543 = vst.msk [vmem:[%s3322_s2 + $0x58] sm:$0xff] %vm378_vm0, %v1527_v51  ;;  %v1512_v36 = vmul.f32 %v2034_v35, %v3316_v56  ;;  %v2035_v31 = vpop.f32.mrb[58].mxu0 }
 0x419   : > { %v2036_v2 = vpop.f32.mrb[59].mxu0 }
 0x41a   : > { %v1528_v18 = vadd.f32 %v2409_v55, %v1512_v36  ;;  %v2037_v0 = vadd.f32 %v2036_v2, %v2035_v31 }
 0x41c   : > { %1544 = vst.msk [vmem:[%s3322_s2 + $0x60] sm:$0xff] %vm378_vm0, %v1528_v18  ;;  %v1513_v26 = vmul.f32 %v2037_v0, %v3316_v56  ;;  %v2038_v59 = vpop.f32.mrb[60].mxu0 }
 0x41d   : > { %v2039_v39 = vpop.f32.mrb[61].mxu0 }
 0x41e   : > { %v1529_v34 = vadd.f32 %v2410_v5, %v1513_v26  ;;  %v2040_v62 = vadd.f32 %v2039_v39, %v2038_v59 }
 0x420   : > { %1545 = vst.msk [vmem:[%s3322_s2 + $0x68] sm:$0xff] %vm378_vm0, %v1529_v34  ;;  %v1514_v20 = vmul.f32 %v2040_v62, %v3316_v56  ;;  %v2041_v32 = vpop.f32.mrb[62].mxu0 }
 0x421   : > { %v2042_v57 = vpop.f32.mrb[63].mxu0 }
 0x422   : > { %v1530_v21 = vadd.f32 %v2411_v1, %v1514_v20  ;;  %v2043_v3 = vadd.f32 %v2042_v57, %v2041_v32 }
 0x424   : > { %1546 = vst.msk [vmem:[%s3322_s2 + $0x70] sm:$0xff] %vm378_vm0, %v1530_v21  ;;  %v1515_v46 = vmul.f32 %v2043_v3, %v3316_v56 }
 0x426   : > { %v1531_v37 = vadd.f32 %v2412_v4, %v1515_v46 }
 0x428   : > { %1547 = vst.msk [vmem:[%s3322_s2 + $0x78] sm:$0xff] %vm378_vm0, %v1531_v37 }
 0x429 PF: > { %p2234_p3 = scmp.ge.s32.totalorder %s2507_s10, 2  ;;  %s1637_s29 = sand.u32 1, %s2479_s26  }
 0x42a   : > { %s1638_s17 = scalar_lea.sflag [#allocation4], %s1637_s29 }
 0x42b   : > { %p2231_p5 = pnand %p2234_p3, %p2615_p8 }
 0x42d   : > { %2474 = dma.done.wait (!%p2231_p5), %s1638_s17, 4096  }
 0x42e   : > { %2476 = vsyncadd (!%p2231_p5), %s1638_s17, 4294963200  ;;  %s22_s10 = sadd.s32 1, %s2507_s10   ;;  %s3435_s26 = smov %s2483_s27 }
 0x42f   : > { %p19_p6 = scmp.ge.s32.totalorder %s22_s10, 6   ;;  %s3436_s27 = smov %s2487_s28 }
 0x430   : > { %s3437_s28 = smov %s2624_s20  ;;  %s3438_s29 = smov %s2499_s8 }
 0x431   : > { %s3439_s30 = smov %s2503_s9  ;;  %s3440_s8 = smov %s3443_s12 }
 0x432   : > { %s3441_s9 = smov %s3447_s13  ;;  %21 = sbr.rel (!%p19_p6) target bundleno = 10 (0xa), region = 92 }
 0x439   :  { %1643 = vsyncpa [#allocation4], 1 }
 0x43a   :  { %1645 = vsyncpa [#allocation4 + $0x1], 1 }

</bundles_post_ra>
